<compile_context>
chip_gen: v5e
topology: v5e:2x2
jax: 0.10.0
libtpu: 0.0.40
codegen_flags: <defaults>
</compile_context>

<pallas_src>
import numpy as np
import jax
import jax.numpy as jnp
from jax.experimental import pallas as pl
from jax.experimental.pallas import tpu as pltpu

# ---- "config" (small synthetic sizes consistent with the module) ----
VOCAB_SIZE = 50
EMB_DIM = 32          # config.emb_dim
HIDDEN_DIM = 32       # config.hidden_dim
RAND_UNIF_INIT_MAG = 0.02
TRUNC_NORM_INIT_STD = 0.1
B = 2
T = 8


# ----------------------------------------------------------------------------
# Fused kernel: bidirectional length-masked LSTM + W_h projection.
# Everything lives in VMEM (tiny shapes); the whole recurrence is unrolled in
# registers; MXU does the two hoisted input projections, the per-step h@W_hh
# matmuls and the final W_h projection.
# ----------------------------------------------------------------------------
def _encoder_kernel(emb_ref,            # (T*B, E)  time-major flattened embeddings
                    mask_ref,           # (T, B, 1) f32, 1.0 iff t < seq_len[b]
                    wih_f_ref, whh_f_ref, b_f_ref,    # (E,4H), (H,4H), (1,4H)
                    wih_b_ref, whh_b_ref, b_b_ref,    # same, reverse direction
                    wht_ref,            # (2H, 2H) = W_h.T
                    enc_ref,            # (B*T, 2H) batch-major encoder outputs
                    feat_ref,           # (B*T, 2H) encoder_feature = enc @ W_h.T
                    hn_ref,             # (2, B, H) final h per direction
                    cn_ref):            # (2, B, H) final c per direction
    Tn, Bn, _ = mask_ref.shape
    H = hn_ref.shape[2]

    # ---- hoisted input projections: one tall MXU matmul per direction ----
    x = emb_ref[...]                                                  # (T*B, E)
    xproj_f = jnp.dot(x, wih_f_ref[...],
                      preferred_element_type=jnp.float32) + b_f_ref[...]   # (T*B, 4H)
    xproj_b = jnp.dot(x, wih_b_ref[...],
                      preferred_element_type=jnp.float32) + b_b_ref[...]   # (T*B, 4H)

    # hoist recurrent weights (loaded once, reused every step)
    whh_f = whh_f_ref[...]
    whh_b = whh_b_ref[...]

    def cell(x_t, h, c, whh):
        # PyTorch gate order: i, f, g, o
        gates = x_t + jnp.dot(h, whh, preferred_element_type=jnp.float32)  # (B, 4H)
        sg = jax.nn.sigmoid(gates)        # one full-width EUP op
        th = jnp.tanh(gates)              # one full-width EUP op
        i = sg[:, 0:H]
        f = sg[:, H:2 * H]
        o = sg[:, 3 * H:4 * H]
        g = th[:, 2 * H:3 * H]
        c_new = f * c + i * g
        h_new = o * jnp.tanh(c_new)
        return h_new, c_new

    zeros = jnp.zeros((Bn, H), jnp.float32)
    h_f, c_f = zeros, zeros
    h_b, c_b = zeros, zeros
    outs_f = [None] * Tn
    outs_b = [None] * Tn

    # Fully unrolled recurrence. At unrolled step s the forward cell processes
    # time s and the backward cell processes time Tn-1-s; the two chains are
    # independent so their MXU/EUP/VPU work co-issues.
    for s in range(Tn):
        tf = s
        tb = Tn - 1 - s
        mf = mask_ref[tf] > 0.0           # (B, 1) bool
        mb = mask_ref[tb] > 0.0
        hf_new, cf_new = cell(xproj_f[tf * Bn:(tf + 1) * Bn, :], h_f, c_f, whh_f)
        hb_new, cb_new = cell(xproj_b[tb * Bn:(tb + 1) * Bn, :], h_b, c_b, whh_b)
        # packed-sequence semantics: freeze state past the sequence end
        h_f = jnp.where(mf, hf_new, h_f)
        c_f = jnp.where(mf, cf_new, c_f)
        h_b = jnp.where(mb, hb_new, h_b)
        c_b = jnp.where(mb, cb_new, c_b)
        # pad_packed_sequence: padded positions are exactly zero
        outs_f[tf] = jnp.where(mf, hf_new, 0.0)
        outs_b[tb] = jnp.where(mb, hb_new, 0.0)

    hn_ref[0] = h_f
    hn_ref[1] = h_b
    cn_ref[0] = c_f
    cn_ref[1] = c_b

    # ---- assemble batch-major (B*T, 2H) slab in-register (row = b*T + t) ----
    slabs = []
    for b in range(Bn):
        fwd = jnp.concatenate([outs_f[t][b:b + 1, :] for t in range(Tn)], axis=0)  # (T, H)
        bwd = jnp.concatenate([outs_b[t][b:b + 1, :] for t in range(Tn)], axis=0)  # (T, H)
        slabs.append(jnp.concatenate([fwd, bwd], axis=1))                          # (T, 2H)
    enc = jnp.concatenate(slabs, axis=0)                                           # (B*T, 2H)

    # lane-dense stores + fused W_h projection (single MXU matmul)
    enc_ref[...] = enc
    feat_ref[...] = jnp.dot(enc, wht_ref[...], preferred_element_type=jnp.float32)


def encoder_fused_pallas(emb_flat, mask_tb1,
                         wih_f, whh_f, b_f, wih_b, whh_b, b_b, w_h_t):
    Tn, Bn, _ = mask_tb1.shape
    H = whh_f.shape[0]
    vmem = pl.BlockSpec(memory_space=pltpu.MemorySpace.VMEM)
    out_shapes = (
        jax.ShapeDtypeStruct((Bn * Tn, 2 * H), jnp.float32),   # encoder outputs (flat, batch-major)
        jax.ShapeDtypeStruct((Bn * Tn, 2 * H), jnp.float32),   # encoder feature
        jax.ShapeDtypeStruct((2, Bn, H), jnp.float32),         # h_n
        jax.ShapeDtypeStruct((2, Bn, H), jnp.float32),         # c_n
    )
    return pl.pallas_call(
        _encoder_kernel,
        out_shape=out_shapes,
        in_specs=[vmem] * 9,
        out_specs=[vmem] * 4,
    )(emb_flat, mask_tb1, wih_f, whh_f, b_f, wih_b, whh_b, b_b, w_h_t)


# ----------------------------------------------------------------------------
# Parameter init (mirrors init_wt_normal / init_lstm_wt shapes & patterns)
# ----------------------------------------------------------------------------
def init_params(key):
    H, E = HIDDEN_DIM, EMB_DIM
    ks = jax.random.split(key, 8)
    emb_w = TRUNC_NORM_INIT_STD * jax.random.normal(ks[0], (VOCAB_SIZE, E), jnp.float32)

    def unif(k, shape):
        return jax.random.uniform(k, shape, jnp.float32,
                                  -RAND_UNIF_INIT_MAG, RAND_UNIF_INIT_MAG)

    # PyTorch weight_ih: (4H, E), weight_hh: (4H, H); stored transposed so the
    # kernel can do x @ W_ih and h @ W_hh directly.
    wih_f = unif(ks[1], (E, 4 * H))
    whh_f = unif(ks[2], (H, 4 * H))
    wih_b = unif(ks[3], (E, 4 * H))
    whh_b = unif(ks[4], (H, 4 * H))
    # init_lstm_wt: biases zero, except [H:2H] (forget gate) = 1.0 in BOTH
    # bias_ih and bias_hh -> combined forget-gate bias of 2.0.
    b_single = jnp.zeros((4 * H,), jnp.float32).at[H:2 * H].set(1.0)
    b_comb = (b_single + b_single).reshape(1, 4 * H)

    # nn.Linear(2H, 2H, bias=False): W has shape (out, in) = (2H, 2H).
    w_h = unif(ks[5], (2 * H, 2 * H))

    return {
        "emb": emb_w,
        "wih_f": wih_f, "whh_f": whh_f, "b_f": b_comb,
        "wih_b": wih_b, "whh_b": whh_b, "b_b": b_comb,
        "w_h": w_h,
    }


# ----------------------------------------------------------------------------
# Encoder.forward (non-hierarchical branch)
# ----------------------------------------------------------------------------
def encoder_forward(params, input_ids, seq_lens):
    # seq_lens is a host-side numpy array in the PyTorch code, too.
    seq_lens_np = np.asarray(seq_lens, dtype=np.int32)
    t_max = int(seq_lens_np.max())          # pad_packed_sequence pads to max(seq_lens)
    Bx, Tx = input_ids.shape
    H = HIDDEN_DIM

    # Embedding gather in time-major flattened row order (row = t*B + b): XLA glue.
    ids_tm = jnp.transpose(input_ids, (1, 0)).reshape(-1)                   # (T*B,)
    emb_flat = jnp.take(params["emb"], ids_tm, axis=0).astype(jnp.float32)  # (T*B, E)

    # Validity mask, time-major, trailing singleton lane dim.
    lens = jnp.asarray(seq_lens_np)
    t_idx = jnp.arange(Tx)[:, None]                                         # (T, 1)
    mask_tb1 = (t_idx < lens[None, :]).astype(jnp.float32)[..., None]       # (T, B, 1)

    enc_flat, feat_flat, h_n, c_n = encoder_fused_pallas(
        emb_flat, mask_tb1,
        params["wih_f"], params["whh_f"], params["b_f"],
        params["wih_b"], params["whh_b"], params["b_b"],
        params["w_h"].T)

    # Free reshapes / row-trims only (no transpose, no concat, no second kernel).
    encoder_outputs = enc_flat.reshape(Bx, Tx, 2 * H)[:, :t_max, :]          # (B, T_max, 2H)
    encoder_feature = feat_flat.reshape(Bx, Tx, 2 * H)[:, :t_max, :].reshape(-1, 2 * H)
    hidden = (h_n, c_n)                                                      # each (2, B, H)
    return encoder_outputs, encoder_feature, hidden

    # TODO(synk): hierarchical branch (split_input / get_sent_level_input) is
    # host-side Python over ragged sent_pos lists and is not expressible as a
    # Pallas kernel; only the non-hierarchical path is implemented.


# ----------------------------------------------------------------------------
# Pure-JAX reference (same packed-sequence semantics) for a correctness check.
# ----------------------------------------------------------------------------
def _reference_encoder(params, input_ids, seq_lens):
    H = HIDDEN_DIM
    emb = jnp.take(params["emb"], input_ids, axis=0).astype(jnp.float32)   # (B, T, E)
    Bx, Tx, _ = emb.shape
    lens = jnp.asarray(np.asarray(seq_lens, dtype=np.int32))

    def run_dir(wih, whh, bias, reverse):
        h = jnp.zeros((Bx, H), jnp.float32)
        c = jnp.zeros((Bx, H), jnp.float32)
        outs = [None] * Tx
        order = range(Tx - 1, -1, -1) if reverse else range(Tx)
        for t in order:
            x_t = emb[:, t, :]
            m = (t < lens).astype(jnp.float32)[:, None]
            gates = x_t @ wih + h @ whh + bias
            i = jax.nn.sigmoid(gates[:, 0:H])
            f = jax.nn.sigmoid(gates[:, H:2 * H])
            g = jnp.tanh(gates[:, 2 * H:3 * H])
            o = jax.nn.sigmoid(gates[:, 3 * H:4 * H])
            c_new = f * c + i * g
            h_new = o * jnp.tanh(c_new)
            h = m * h_new + (1.0 - m) * h
            c = m * c_new + (1.0 - m) * c
            outs[t] = m * h_new
        return jnp.stack(outs, axis=1), h, c                    # (B, T, H)

    of, hf, cf = run_dir(params["wih_f"], params["whh_f"], params["b_f"], False)
    ob, hb, cb = run_dir(params["wih_b"], params["whh_b"], params["b_b"], True)
    t_max = int(np.asarray(seq_lens).max())
    enc = jnp.concatenate([of, ob], axis=-1)[:, :t_max, :]
    feat = enc.reshape(-1, 2 * H) @ params["w_h"].T
    h_n = jnp.stack([hf, hb], axis=0)
    c_n = jnp.stack([cf, cb], axis=0)
    return enc, feat, (h_n, c_n)


if __name__ == "__main__":
    key = jax.random.PRNGKey(0)
    pkey, ikey = jax.random.split(key)
    params = init_params(pkey)

    input_ids = jax.random.randint(ikey, (B, T), 1, VOCAB_SIZE, dtype=jnp.int32)
    seq_lens = np.array([T, 5], dtype=np.int32)   # enforce_sorted=False -> any order ok

    encoder_outputs, encoder_feature, (h_n, c_n) = encoder_forward(
        params, input_ids, seq_lens)
    jax.block_until_ready((encoder_outputs, encoder_feature, h_n, c_n))

    t_max = int(seq_lens.max())
    assert encoder_outputs.shape == (B, t_max, 2 * HIDDEN_DIM)
    assert encoder_feature.shape == (B * t_max, 2 * HIDDEN_DIM)
    assert h_n.shape == (2, B, HIDDEN_DIM) and c_n.shape == (2, B, HIDDEN_DIM)
    assert bool(jnp.all(jnp.isfinite(encoder_outputs)))
    # padded positions of the shorter sequence must be exactly zero
    assert bool(jnp.all(encoder_outputs[1, 5:, :] == 0.0))

    # numerical check against the pure-JAX reference
    r_enc, r_feat, (r_hn, r_cn) = _reference_encoder(params, input_ids, seq_lens)
    assert float(jnp.max(jnp.abs(encoder_outputs - r_enc))) < 5e-3
    assert float(jnp.max(jnp.abs(encoder_feature - r_feat))) < 5e-3
    assert float(jnp.max(jnp.abs(h_n - r_hn))) < 5e-3
    assert float(jnp.max(jnp.abs(c_n - r_cn))) < 5e-3

    print("KERNEL_OK")
</pallas_src>

<mosaic_0001>
module attributes {stable_mosaic.version = 11 : i64} {
  func.func @_encoder_kernel(%arg0: memref<16x32xf32, #tpu.memory_space<vmem>>, %arg1: memref<8x2x1xf32, #tpu.memory_space<vmem>>, %arg2: memref<32x128xf32, #tpu.memory_space<vmem>>, %arg3: memref<32x128xf32, #tpu.memory_space<vmem>>, %arg4: memref<1x128xf32, #tpu.memory_space<vmem>>, %arg5: memref<32x128xf32, #tpu.memory_space<vmem>>, %arg6: memref<32x128xf32, #tpu.memory_space<vmem>>, %arg7: memref<1x128xf32, #tpu.memory_space<vmem>>, %arg8: memref<64x64xf32, #tpu.memory_space<vmem>>, %arg9: memref<16x64xf32, #tpu.memory_space<vmem>>, %arg10: memref<16x64xf32, #tpu.memory_space<vmem>>, %arg11: memref<2x2x32xf32, #tpu.memory_space<vmem>>, %arg12: memref<2x2x32xf32, #tpu.memory_space<vmem>>) attributes {dimension_semantics = [], scalar_prefetch = 0 : i64, scratch_operands = 0 : i64, tpu.core_type = #tpu.core_type<tc>} {
    %c0 = arith.constant 0 : index
    %c0_0 = arith.constant 0 : index
    %0 = vector.load %arg0[%c0, %c0_0] : memref<16x32xf32, #tpu.memory_space<vmem>>, vector<16x32xf32>
    %c0_1 = arith.constant 0 : index
    %c0_2 = arith.constant 0 : index
    %1 = vector.load %arg2[%c0_1, %c0_2] : memref<32x128xf32, #tpu.memory_space<vmem>>, vector<32x128xf32>
    %cst = arith.constant dense<0.000000e+00> : vector<16x128xf32>
    %2 = tpu.matmul %0, %1, %cst {dimension_numbers = #tpu.dot_dimension_numbers<[1], [0], [0], [1], [0, 0, 1, 1], [], []>} : vector<16x32xf32>, vector<32x128xf32>, vector<16x128xf32> -> vector<16x128xf32>
    %c0_3 = arith.constant 0 : index
    %c0_4 = arith.constant 0 : index
    %3 = vector.load %arg4[%c0_3, %c0_4] : memref<1x128xf32, #tpu.memory_space<vmem>>, vector<1x128xf32>
    %4 = vector.broadcast %3 : vector<1x128xf32> to vector<16x128xf32>
    %5 = arith.addf %2, %4 : vector<16x128xf32>
    %c0_5 = arith.constant 0 : index
    %c0_6 = arith.constant 0 : index
    %6 = vector.load %arg5[%c0_5, %c0_6] : memref<32x128xf32, #tpu.memory_space<vmem>>, vector<32x128xf32>
    %cst_7 = arith.constant dense<0.000000e+00> : vector<16x128xf32>
    %7 = tpu.matmul %0, %6, %cst_7 {dimension_numbers = #tpu.dot_dimension_numbers<[1], [0], [0], [1], [0, 0, 1, 1], [], []>} : vector<16x32xf32>, vector<32x128xf32>, vector<16x128xf32> -> vector<16x128xf32>
    %c0_8 = arith.constant 0 : index
    %c0_9 = arith.constant 0 : index
    %8 = vector.load %arg7[%c0_8, %c0_9] : memref<1x128xf32, #tpu.memory_space<vmem>>, vector<1x128xf32>
    %9 = vector.broadcast %8 : vector<1x128xf32> to vector<16x128xf32>
    %10 = arith.addf %7, %9 : vector<16x128xf32>
    %c0_10 = arith.constant 0 : index
    %c0_11 = arith.constant 0 : index
    %11 = vector.load %arg3[%c0_10, %c0_11] : memref<32x128xf32, #tpu.memory_space<vmem>>, vector<32x128xf32>
    %c0_12 = arith.constant 0 : index
    %c0_13 = arith.constant 0 : index
    %12 = vector.load %arg6[%c0_12, %c0_13] : memref<32x128xf32, #tpu.memory_space<vmem>>, vector<32x128xf32>
    %cst_14 = arith.constant 0.000000e+00 : f32
    %13 = vector.broadcast %cst_14 : f32 to vector<2x32xf32>
    %c0_15 = arith.constant 0 : index
    %c0_16 = arith.constant 0 : index
    %c0_17 = arith.constant 0 : index
    %14 = vector.load %arg1[%c0_15, %c0_16, %c0_17] : memref<8x2x1xf32, #tpu.memory_space<vmem>>, vector<1x2x1xf32>
    %15 = vector.shape_cast %14 : vector<1x2x1xf32> to vector<2x1xf32>
    %cst_18 = arith.constant 0.000000e+00 : f32
    %16 = vector.broadcast %cst_18 : f32 to vector<2x1xf32>
    %17 = arith.cmpf ogt, %15, %16 : vector<2x1xf32>
    %c7 = arith.constant 7 : index
    %c0_19 = arith.constant 0 : index
    %c0_20 = arith.constant 0 : index
    %18 = vector.load %arg1[%c7, %c0_19, %c0_20] : memref<8x2x1xf32, #tpu.memory_space<vmem>>, vector<1x2x1xf32>
    %19 = vector.shape_cast %18 : vector<1x2x1xf32> to vector<2x1xf32>
    %cst_21 = arith.constant 0.000000e+00 : f32
    %20 = vector.broadcast %cst_21 : f32 to vector<2x1xf32>
    %21 = arith.cmpf ogt, %19, %20 : vector<2x1xf32>
    %22 = vector.extract_strided_slice %5 {offsets = [0, 0], sizes = [2, 128], strides = [1, 1]} : vector<16x128xf32> to vector<2x128xf32>
    %cst_22 = arith.constant dense<0.000000e+00> : vector<2x128xf32>
    %23 = tpu.matmul %13, %11, %cst_22 {dimension_numbers = #tpu.dot_dimension_numbers<[1], [0], [0], [1], [0, 0, 1, 1], [], []>} : vector<2x32xf32>, vector<32x128xf32>, vector<2x128xf32> -> vector<2x128xf32>
    %24 = arith.addf %22, %23 : vector<2x128xf32>
    %25 = arith.negf %24 : vector<2x128xf32>
    %26 = math.exp %25 : vector<2x128xf32>
    %cst_23 = arith.constant 1.000000e+00 : f32
    %27 = vector.broadcast %cst_23 : f32 to vector<2x128xf32>
    %28 = arith.addf %27, %26 : vector<2x128xf32>
    %29 = arith.divf %27, %28 : vector<2x128xf32>
    %30 = math.tanh %24 : vector<2x128xf32>
    %31 = vector.extract_strided_slice %29 {offsets = [0, 0], sizes = [2, 32], strides = [1, 1]} : vector<2x128xf32> to vector<2x32xf32>
    %32 = vector.extract_strided_slice %29 {offsets = [0, 32], sizes = [2, 32], strides = [1, 1]} : vector<2x128xf32> to vector<2x32xf32>
    %33 = vector.extract_strided_slice %29 {offsets = [0, 96], sizes = [2, 32], strides = [1, 1]} : vector<2x128xf32> to vector<2x32xf32>
    %34 = vector.extract_strided_slice %30 {offsets = [0, 64], sizes = [2, 32], strides = [1, 1]} : vector<2x128xf32> to vector<2x32xf32>
    %35 = arith.mulf %32, %13 : vector<2x32xf32>
    %36 = arith.mulf %31, %34 : vector<2x32xf32>
    %37 = arith.addf %35, %36 : vector<2x32xf32>
    %38 = math.tanh %37 : vector<2x32xf32>
    %39 = arith.mulf %33, %38 : vector<2x32xf32>
    %40 = vector.extract_strided_slice %10 {offsets = [14, 0], sizes = [2, 128], strides = [1, 1]} : vector<16x128xf32> to vector<2x128xf32>
    %cst_24 = arith.constant dense<0.000000e+00> : vector<2x128xf32>
    %41 = tpu.matmul %13, %12, %cst_24 {dimension_numbers = #tpu.dot_dimension_numbers<[1], [0], [0], [1], [0, 0, 1, 1], [], []>} : vector<2x32xf32>, vector<32x128xf32>, vector<2x128xf32> -> vector<2x128xf32>
    %42 = arith.addf %40, %41 : vector<2x128xf32>
    %43 = arith.negf %42 : vector<2x128xf32>
    %44 = math.exp %43 : vector<2x128xf32>
    %cst_25 = arith.constant 1.000000e+00 : f32
    %45 = vector.broadcast %cst_25 : f32 to vector<2x128xf32>
    %46 = arith.addf %45, %44 : vector<2x128xf32>
    %47 = arith.divf %45, %46 : vector<2x128xf32>
    %48 = math.tanh %42 : vector<2x128xf32>
    %49 = vector.extract_strided_slice %47 {offsets = [0, 0], sizes = [2, 32], strides = [1, 1]} : vector<2x128xf32> to vector<2x32xf32>
    %50 = vector.extract_strided_slice %47 {offsets = [0, 32], sizes = [2, 32], strides = [1, 1]} : vector<2x128xf32> to vector<2x32xf32>
    %51 = vector.extract_strided_slice %47 {offsets = [0, 96], sizes = [2, 32], strides = [1, 1]} : vector<2x128xf32> to vector<2x32xf32>
    %52 = vector.extract_strided_slice %48 {offsets = [0, 64], sizes = [2, 32], strides = [1, 1]} : vector<2x128xf32> to vector<2x32xf32>
    %53 = arith.mulf %50, %13 : vector<2x32xf32>
    %54 = arith.mulf %49, %52 : vector<2x32xf32>
    %55 = arith.addf %53, %54 : vector<2x32xf32>
    %56 = math.tanh %55 : vector<2x32xf32>
    %57 = arith.mulf %51, %56 : vector<2x32xf32>
    %58 = vector.shape_cast %17 : vector<2x1xi1> to vector<2x1xi1>
    %59 = vector.broadcast %58 : vector<2x1xi1> to vector<2x32xi1>
    %60 = arith.select %59, %39, %13 : vector<2x32xi1>, vector<2x32xf32>
    %61 = vector.shape_cast %17 : vector<2x1xi1> to vector<2x1xi1>
    %62 = vector.broadcast %61 : vector<2x1xi1> to vector<2x32xi1>
    %63 = arith.select %62, %37, %13 : vector<2x32xi1>, vector<2x32xf32>
    %64 = vector.shape_cast %21 : vector<2x1xi1> to vector<2x1xi1>
    %65 = vector.broadcast %64 : vector<2x1xi1> to vector<2x32xi1>
    %66 = arith.select %65, %57, %13 : vector<2x32xi1>, vector<2x32xf32>
    %67 = vector.shape_cast %21 : vector<2x1xi1> to vector<2x1xi1>
    %68 = vector.broadcast %67 : vector<2x1xi1> to vector<2x32xi1>
    %69 = arith.select %68, %55, %13 : vector<2x32xi1>, vector<2x32xf32>
    %cst_26 = arith.constant 0.000000e+00 : f32
    %70 = vector.shape_cast %17 : vector<2x1xi1> to vector<2x1xi1>
    %71 = vector.broadcast %70 : vector<2x1xi1> to vector<2x32xi1>
    %72 = vector.broadcast %cst_26 : f32 to vector<2x32xf32>
    %73 = arith.select %71, %39, %72 : vector<2x32xi1>, vector<2x32xf32>
    %cst_27 = arith.constant 0.000000e+00 : f32
    %74 = vector.shape_cast %21 : vector<2x1xi1> to vector<2x1xi1>
    %75 = vector.broadcast %74 : vector<2x1xi1> to vector<2x32xi1>
    %76 = vector.broadcast %cst_27 : f32 to vector<2x32xf32>
    %77 = arith.select %75, %57, %76 : vector<2x32xi1>, vector<2x32xf32>
    %c1 = arith.constant 1 : index
    %c0_28 = arith.constant 0 : index
    %c0_29 = arith.constant 0 : index
    %78 = vector.load %arg1[%c1, %c0_28, %c0_29] : memref<8x2x1xf32, #tpu.memory_space<vmem>>, vector<1x2x1xf32>
    %79 = vector.shape_cast %78 : vector<1x2x1xf32> to vector<2x1xf32>
    %cst_30 = arith.constant 0.000000e+00 : f32
    %80 = vector.broadcast %cst_30 : f32 to vector<2x1xf32>
    %81 = arith.cmpf ogt, %79, %80 : vector<2x1xf32>
    %c6 = arith.constant 6 : index
    %c0_31 = arith.constant 0 : index
    %c0_32 = arith.constant 0 : index
    %82 = vector.load %arg1[%c6, %c0_31, %c0_32] : memref<8x2x1xf32, #tpu.memory_space<vmem>>, vector<1x2x1xf32>
    %83 = vector.shape_cast %82 : vector<1x2x1xf32> to vector<2x1xf32>
    %cst_33 = arith.constant 0.000000e+00 : f32
    %84 = vector.broadcast %cst_33 : f32 to vector<2x1xf32>
    %85 = arith.cmpf ogt, %83, %84 : vector<2x1xf32>
    %86 = vector.extract_strided_slice %5 {offsets = [2, 0], sizes = [2, 128], strides = [1, 1]} : vector<16x128xf32> to vector<2x128xf32>
    %cst_34 = arith.constant dense<0.000000e+00> : vector<2x128xf32>
    %87 = tpu.matmul %60, %11, %cst_34 {dimension_numbers = #tpu.dot_dimension_numbers<[1], [0], [0], [1], [0, 0, 1, 1], [], []>} : vector<2x32xf32>, vector<32x128xf32>, vector<2x128xf32> -> vector<2x128xf32>
    %88 = arith.addf %86, %87 : vector<2x128xf32>
    %89 = arith.negf %88 : vector<2x128xf32>
    %90 = math.exp %89 : vector<2x128xf32>
    %cst_35 = arith.constant 1.000000e+00 : f32
    %91 = vector.broadcast %cst_35 : f32 to vector<2x128xf32>
    %92 = arith.addf %91, %90 : vector<2x128xf32>
    %93 = arith.divf %91, %92 : vector<2x128xf32>
    %94 = math.tanh %88 : vector<2x128xf32>
    %95 = vector.extract_strided_slice %93 {offsets = [0, 0], sizes = [2, 32], strides = [1, 1]} : vector<2x128xf32> to vector<2x32xf32>
    %96 = vector.extract_strided_slice %93 {offsets = [0, 32], sizes = [2, 32], strides = [1, 1]} : vector<2x128xf32> to vector<2x32xf32>
    %97 = vector.extract_strided_slice %93 {offsets = [0, 96], sizes = [2, 32], strides = [1, 1]} : vector<2x128xf32> to vector<2x32xf32>
    %98 = vector.extract_strided_slice %94 {offsets = [0, 64], sizes = [2, 32], strides = [1, 1]} : vector<2x128xf32> to vector<2x32xf32>
    %99 = arith.mulf %96, %63 : vector<2x32xf32>
    %100 = arith.mulf %95, %98 : vector<2x32xf32>
    %101 = arith.addf %99, %100 : vector<2x32xf32>
    %102 = math.tanh %101 : vector<2x32xf32>
    %103 = arith.mulf %97, %102 : vector<2x32xf32>
    %104 = vector.extract_strided_slice %10 {offsets = [12, 0], sizes = [2, 128], strides = [1, 1]} : vector<16x128xf32> to vector<2x128xf32>
    %cst_36 = arith.constant dense<0.000000e+00> : vector<2x128xf32>
    %105 = tpu.matmul %66, %12, %cst_36 {dimension_numbers = #tpu.dot_dimension_numbers<[1], [0], [0], [1], [0, 0, 1, 1], [], []>} : vector<2x32xf32>, vector<32x128xf32>, vector<2x128xf32> -> vector<2x128xf32>
    %106 = arith.addf %104, %105 : vector<2x128xf32>
    %107 = arith.negf %106 : vector<2x128xf32>
    %108 = math.exp %107 : vector<2x128xf32>
    %cst_37 = arith.constant 1.000000e+00 : f32
    %109 = vector.broadcast %cst_37 : f32 to vector<2x128xf32>
    %110 = arith.addf %109, %108 : vector<2x128xf32>
    %111 = arith.divf %109, %110 : vector<2x128xf32>
    %112 = math.tanh %106 : vector<2x128xf32>
    %113 = vector.extract_strided_slice %111 {offsets = [0, 0], sizes = [2, 32], strides = [1, 1]} : vector<2x128xf32> to vector<2x32xf32>
    %114 = vector.extract_strided_slice %111 {offsets = [0, 32], sizes = [2, 32], strides = [1, 1]} : vector<2x128xf32> to vector<2x32xf32>
    %115 = vector.extract_strided_slice %111 {offsets = [0, 96], sizes = [2, 32], strides = [1, 1]} : vector<2x128xf32> to vector<2x32xf32>
    %116 = vector.extract_strided_slice %112 {offsets = [0, 64], sizes = [2, 32], strides = [1, 1]} : vector<2x128xf32> to vector<2x32xf32>
    %117 = arith.mulf %114, %69 : vector<2x32xf32>
    %118 = arith.mulf %113, %116 : vector<2x32xf32>
    %119 = arith.addf %117, %118 : vector<2x32xf32>
    %120 = math.tanh %119 : vector<2x32xf32>
    %121 = arith.mulf %115, %120 : vector<2x32xf32>
    %122 = vector.shape_cast %81 : vector<2x1xi1> to vector<2x1xi1>
    %123 = vector.broadcast %122 : vector<2x1xi1> to vector<2x32xi1>
    %124 = arith.select %123, %103, %60 : vector<2x32xi1>, vector<2x32xf32>
    %125 = vector.shape_cast %81 : vector<2x1xi1> to vector<2x1xi1>
    %126 = vector.broadcast %125 : vector<2x1xi1> to vector<2x32xi1>
    %127 = arith.select %126, %101, %63 : vector<2x32xi1>, vector<2x32xf32>
    %128 = vector.shape_cast %85 : vector<2x1xi1> to vector<2x1xi1>
    %129 = vector.broadcast %128 : vector<2x1xi1> to vector<2x32xi1>
    %130 = arith.select %129, %121, %66 : vector<2x32xi1>, vector<2x32xf32>
    %131 = vector.shape_cast %85 : vector<2x1xi1> to vector<2x1xi1>
    %132 = vector.broadcast %131 : vector<2x1xi1> to vector<2x32xi1>
    %133 = arith.select %132, %119, %69 : vector<2x32xi1>, vector<2x32xf32>
    %cst_38 = arith.constant 0.000000e+00 : f32
    %134 = vector.shape_cast %81 : vector<2x1xi1> to vector<2x1xi1>
    %135 = vector.broadcast %134 : vector<2x1xi1> to vector<2x32xi1>
    %136 = vector.broadcast %cst_38 : f32 to vector<2x32xf32>
    %137 = arith.select %135, %103, %136 : vector<2x32xi1>, vector<2x32xf32>
    %cst_39 = arith.constant 0.000000e+00 : f32
    %138 = vector.shape_cast %85 : vector<2x1xi1> to vector<2x1xi1>
    %139 = vector.broadcast %138 : vector<2x1xi1> to vector<2x32xi1>
    %140 = vector.broadcast %cst_39 : f32 to vector<2x32xf32>
    %141 = arith.select %139, %121, %140 : vector<2x32xi1>, vector<2x32xf32>
    %c2 = arith.constant 2 : index
    %c0_40 = arith.constant 0 : index
    %c0_41 = arith.constant 0 : index
    %142 = vector.load %arg1[%c2, %c0_40, %c0_41] : memref<8x2x1xf32, #tpu.memory_space<vmem>>, vector<1x2x1xf32>
    %143 = vector.shape_cast %142 : vector<1x2x1xf32> to vector<2x1xf32>
    %cst_42 = arith.constant 0.000000e+00 : f32
    %144 = vector.broadcast %cst_42 : f32 to vector<2x1xf32>
    %145 = arith.cmpf ogt, %143, %144 : vector<2x1xf32>
    %c5 = arith.constant 5 : index
    %c0_43 = arith.constant 0 : index
    %c0_44 = arith.constant 0 : index
    %146 = vector.load %arg1[%c5, %c0_43, %c0_44] : memref<8x2x1xf32, #tpu.memory_space<vmem>>, vector<1x2x1xf32>
    %147 = vector.shape_cast %146 : vector<1x2x1xf32> to vector<2x1xf32>
    %cst_45 = arith.constant 0.000000e+00 : f32
    %148 = vector.broadcast %cst_45 : f32 to vector<2x1xf32>
    %149 = arith.cmpf ogt, %147, %148 : vector<2x1xf32>
    %150 = vector.extract_strided_slice %5 {offsets = [4, 0], sizes = [2, 128], strides = [1, 1]} : vector<16x128xf32> to vector<2x128xf32>
    %cst_46 = arith.constant dense<0.000000e+00> : vector<2x128xf32>
    %151 = tpu.matmul %124, %11, %cst_46 {dimension_numbers = #tpu.dot_dimension_numbers<[1], [0], [0], [1], [0, 0, 1, 1], [], []>} : vector<2x32xf32>, vector<32x128xf32>, vector<2x128xf32> -> vector<2x128xf32>
    %152 = arith.addf %150, %151 : vector<2x128xf32>
    %153 = arith.negf %152 : vector<2x128xf32>
    %154 = math.exp %153 : vector<2x128xf32>
    %cst_47 = arith.constant 1.000000e+00 : f32
    %155 = vector.broadcast %cst_47 : f32 to vector<2x128xf32>
    %156 = arith.addf %155, %154 : vector<2x128xf32>
    %157 = arith.divf %155, %156 : vector<2x128xf32>
    %158 = math.tanh %152 : vector<2x128xf32>
    %159 = vector.extract_strided_slice %157 {offsets = [0, 0], sizes = [2, 32], strides = [1, 1]} : vector<2x128xf32> to vector<2x32xf32>
    %160 = vector.extract_strided_slice %157 {offsets = [0, 32], sizes = [2, 32], strides = [1, 1]} : vector<2x128xf32> to vector<2x32xf32>
    %161 = vector.extract_strided_slice %157 {offsets = [0, 96], sizes = [2, 32], strides = [1, 1]} : vector<2x128xf32> to vector<2x32xf32>
    %162 = vector.extract_strided_slice %158 {offsets = [0, 64], sizes = [2, 32], strides = [1, 1]} : vector<2x128xf32> to vector<2x32xf32>
    %163 = arith.mulf %160, %127 : vector<2x32xf32>
    %164 = arith.mulf %159, %162 : vector<2x32xf32>
    %165 = arith.addf %163, %164 : vector<2x32xf32>
    %166 = math.tanh %165 : vector<2x32xf32>
    %167 = arith.mulf %161, %166 : vector<2x32xf32>
    %168 = vector.extract_strided_slice %10 {offsets = [10, 0], sizes = [2, 128], strides = [1, 1]} : vector<16x128xf32> to vector<2x128xf32>
    %cst_48 = arith.constant dense<0.000000e+00> : vector<2x128xf32>
    %169 = tpu.matmul %130, %12, %cst_48 {dimension_numbers = #tpu.dot_dimension_numbers<[1], [0], [0], [1], [0, 0, 1, 1], [], []>} : vector<2x32xf32>, vector<32x128xf32>, vector<2x128xf32> -> vector<2x128xf32>
    %170 = arith.addf %168, %169 : vector<2x128xf32>
    %171 = arith.negf %170 : vector<2x128xf32>
    %172 = math.exp %171 : vector<2x128xf32>
    %cst_49 = arith.constant 1.000000e+00 : f32
    %173 = vector.broadcast %cst_49 : f32 to vector<2x128xf32>
    %174 = arith.addf %173, %172 : vector<2x128xf32>
    %175 = arith.divf %173, %174 : vector<2x128xf32>
    %176 = math.tanh %170 : vector<2x128xf32>
    %177 = vector.extract_strided_slice %175 {offsets = [0, 0], sizes = [2, 32], strides = [1, 1]} : vector<2x128xf32> to vector<2x32xf32>
    %178 = vector.extract_strided_slice %175 {offsets = [0, 32], sizes = [2, 32], strides = [1, 1]} : vector<2x128xf32> to vector<2x32xf32>
    %179 = vector.extract_strided_slice %175 {offsets = [0, 96], sizes = [2, 32], strides = [1, 1]} : vector<2x128xf32> to vector<2x32xf32>
    %180 = vector.extract_strided_slice %176 {offsets = [0, 64], sizes = [2, 32], strides = [1, 1]} : vector<2x128xf32> to vector<2x32xf32>
    %181 = arith.mulf %178, %133 : vector<2x32xf32>
    %182 = arith.mulf %177, %180 : vector<2x32xf32>
    %183 = arith.addf %181, %182 : vector<2x32xf32>
    %184 = math.tanh %183 : vector<2x32xf32>
    %185 = arith.mulf %179, %184 : vector<2x32xf32>
    %186 = vector.shape_cast %145 : vector<2x1xi1> to vector<2x1xi1>
    %187 = vector.broadcast %186 : vector<2x1xi1> to vector<2x32xi1>
    %188 = arith.select %187, %167, %124 : vector<2x32xi1>, vector<2x32xf32>
    %189 = vector.shape_cast %145 : vector<2x1xi1> to vector<2x1xi1>
    %190 = vector.broadcast %189 : vector<2x1xi1> to vector<2x32xi1>
    %191 = arith.select %190, %165, %127 : vector<2x32xi1>, vector<2x32xf32>
    %192 = vector.shape_cast %149 : vector<2x1xi1> to vector<2x1xi1>
    %193 = vector.broadcast %192 : vector<2x1xi1> to vector<2x32xi1>
    %194 = arith.select %193, %185, %130 : vector<2x32xi1>, vector<2x32xf32>
    %195 = vector.shape_cast %149 : vector<2x1xi1> to vector<2x1xi1>
    %196 = vector.broadcast %195 : vector<2x1xi1> to vector<2x32xi1>
    %197 = arith.select %196, %183, %133 : vector<2x32xi1>, vector<2x32xf32>
    %cst_50 = arith.constant 0.000000e+00 : f32
    %198 = vector.shape_cast %145 : vector<2x1xi1> to vector<2x1xi1>
    %199 = vector.broadcast %198 : vector<2x1xi1> to vector<2x32xi1>
    %200 = vector.broadcast %cst_50 : f32 to vector<2x32xf32>
    %201 = arith.select %199, %167, %200 : vector<2x32xi1>, vector<2x32xf32>
    %cst_51 = arith.constant 0.000000e+00 : f32
    %202 = vector.shape_cast %149 : vector<2x1xi1> to vector<2x1xi1>
    %203 = vector.broadcast %202 : vector<2x1xi1> to vector<2x32xi1>
    %204 = vector.broadcast %cst_51 : f32 to vector<2x32xf32>
    %205 = arith.select %203, %185, %204 : vector<2x32xi1>, vector<2x32xf32>
    %c3 = arith.constant 3 : index
    %c0_52 = arith.constant 0 : index
    %c0_53 = arith.constant 0 : index
    %206 = vector.load %arg1[%c3, %c0_52, %c0_53] : memref<8x2x1xf32, #tpu.memory_space<vmem>>, vector<1x2x1xf32>
    %207 = vector.shape_cast %206 : vector<1x2x1xf32> to vector<2x1xf32>
    %cst_54 = arith.constant 0.000000e+00 : f32
    %208 = vector.broadcast %cst_54 : f32 to vector<2x1xf32>
    %209 = arith.cmpf ogt, %207, %208 : vector<2x1xf32>
    %c4 = arith.constant 4 : index
    %c0_55 = arith.constant 0 : index
    %c0_56 = arith.constant 0 : index
    %210 = vector.load %arg1[%c4, %c0_55, %c0_56] : memref<8x2x1xf32, #tpu.memory_space<vmem>>, vector<1x2x1xf32>
    %211 = vector.shape_cast %210 : vector<1x2x1xf32> to vector<2x1xf32>
    %cst_57 = arith.constant 0.000000e+00 : f32
    %212 = vector.broadcast %cst_57 : f32 to vector<2x1xf32>
    %213 = arith.cmpf ogt, %211, %212 : vector<2x1xf32>
    %214 = vector.extract_strided_slice %5 {offsets = [6, 0], sizes = [2, 128], strides = [1, 1]} : vector<16x128xf32> to vector<2x128xf32>
    %cst_58 = arith.constant dense<0.000000e+00> : vector<2x128xf32>
    %215 = tpu.matmul %188, %11, %cst_58 {dimension_numbers = #tpu.dot_dimension_numbers<[1], [0], [0], [1], [0, 0, 1, 1], [], []>} : vector<2x32xf32>, vector<32x128xf32>, vector<2x128xf32> -> vector<2x128xf32>
    %216 = arith.addf %214, %215 : vector<2x128xf32>
    %217 = arith.negf %216 : vector<2x128xf32>
    %218 = math.exp %217 : vector<2x128xf32>
    %cst_59 = arith.constant 1.000000e+00 : f32
    %219 = vector.broadcast %cst_59 : f32 to vector<2x128xf32>
    %220 = arith.addf %219, %218 : vector<2x128xf32>
    %221 = arith.divf %219, %220 : vector<2x128xf32>
    %222 = math.tanh %216 : vector<2x128xf32>
    %223 = vector.extract_strided_slice %221 {offsets = [0, 0], sizes = [2, 32], strides = [1, 1]} : vector<2x128xf32> to vector<2x32xf32>
    %224 = vector.extract_strided_slice %221 {offsets = [0, 32], sizes = [2, 32], strides = [1, 1]} : vector<2x128xf32> to vector<2x32xf32>
    %225 = vector.extract_strided_slice %221 {offsets = [0, 96], sizes = [2, 32], strides = [1, 1]} : vector<2x128xf32> to vector<2x32xf32>
    %226 = vector.extract_strided_slice %222 {offsets = [0, 64], sizes = [2, 32], strides = [1, 1]} : vector<2x128xf32> to vector<2x32xf32>
    %227 = arith.mulf %224, %191 : vector<2x32xf32>
    %228 = arith.mulf %223, %226 : vector<2x32xf32>
    %229 = arith.addf %227, %228 : vector<2x32xf32>
    %230 = math.tanh %229 : vector<2x32xf32>
    %231 = arith.mulf %225, %230 : vector<2x32xf32>
    %232 = vector.extract_strided_slice %10 {offsets = [8, 0], sizes = [2, 128], strides = [1, 1]} : vector<16x128xf32> to vector<2x128xf32>
    %cst_60 = arith.constant dense<0.000000e+00> : vector<2x128xf32>
    %233 = tpu.matmul %194, %12, %cst_60 {dimension_numbers = #tpu.dot_dimension_numbers<[1], [0], [0], [1], [0, 0, 1, 1], [], []>} : vector<2x32xf32>, vector<32x128xf32>, vector<2x128xf32> -> vector<2x128xf32>
    %234 = arith.addf %232, %233 : vector<2x128xf32>
    %235 = arith.negf %234 : vector<2x128xf32>
    %236 = math.exp %235 : vector<2x128xf32>
    %cst_61 = arith.constant 1.000000e+00 : f32
    %237 = vector.broadcast %cst_61 : f32 to vector<2x128xf32>
    %238 = arith.addf %237, %236 : vector<2x128xf32>
    %239 = arith.divf %237, %238 : vector<2x128xf32>
    %240 = math.tanh %234 : vector<2x128xf32>
    %241 = vector.extract_strided_slice %239 {offsets = [0, 0], sizes = [2, 32], strides = [1, 1]} : vector<2x128xf32> to vector<2x32xf32>
    %242 = vector.extract_strided_slice %239 {offsets = [0, 32], sizes = [2, 32], strides = [1, 1]} : vector<2x128xf32> to vector<2x32xf32>
    %243 = vector.extract_strided_slice %239 {offsets = [0, 96], sizes = [2, 32], strides = [1, 1]} : vector<2x128xf32> to vector<2x32xf32>
    %244 = vector.extract_strided_slice %240 {offsets = [0, 64], sizes = [2, 32], strides = [1, 1]} : vector<2x128xf32> to vector<2x32xf32>
    %245 = arith.mulf %242, %197 : vector<2x32xf32>
    %246 = arith.mulf %241, %244 : vector<2x32xf32>
    %247 = arith.addf %245, %246 : vector<2x32xf32>
    %248 = math.tanh %247 : vector<2x32xf32>
    %249 = arith.mulf %243, %248 : vector<2x32xf32>
    %250 = vector.shape_cast %209 : vector<2x1xi1> to vector<2x1xi1>
    %251 = vector.broadcast %250 : vector<2x1xi1> to vector<2x32xi1>
    %252 = arith.select %251, %231, %188 : vector<2x32xi1>, vector<2x32xf32>
    %253 = vector.shape_cast %209 : vector<2x1xi1> to vector<2x1xi1>
    %254 = vector.broadcast %253 : vector<2x1xi1> to vector<2x32xi1>
    %255 = arith.select %254, %229, %191 : vector<2x32xi1>, vector<2x32xf32>
    %256 = vector.shape_cast %213 : vector<2x1xi1> to vector<2x1xi1>
    %257 = vector.broadcast %256 : vector<2x1xi1> to vector<2x32xi1>
    %258 = arith.select %257, %249, %194 : vector<2x32xi1>, vector<2x32xf32>
    %259 = vector.shape_cast %213 : vector<2x1xi1> to vector<2x1xi1>
    %260 = vector.broadcast %259 : vector<2x1xi1> to vector<2x32xi1>
    %261 = arith.select %260, %247, %197 : vector<2x32xi1>, vector<2x32xf32>
    %cst_62 = arith.constant 0.000000e+00 : f32
    %262 = vector.shape_cast %209 : vector<2x1xi1> to vector<2x1xi1>
    %263 = vector.broadcast %262 : vector<2x1xi1> to vector<2x32xi1>
    %264 = vector.broadcast %cst_62 : f32 to vector<2x32xf32>
    %265 = arith.select %263, %231, %264 : vector<2x32xi1>, vector<2x32xf32>
    %cst_63 = arith.constant 0.000000e+00 : f32
    %266 = vector.shape_cast %213 : vector<2x1xi1> to vector<2x1xi1>
    %267 = vector.broadcast %266 : vector<2x1xi1> to vector<2x32xi1>
    %268 = vector.broadcast %cst_63 : f32 to vector<2x32xf32>
    %269 = arith.select %267, %249, %268 : vector<2x32xi1>, vector<2x32xf32>
    %c4_64 = arith.constant 4 : index
    %c0_65 = arith.constant 0 : index
    %c0_66 = arith.constant 0 : index
    %270 = vector.load %arg1[%c4_64, %c0_65, %c0_66] : memref<8x2x1xf32, #tpu.memory_space<vmem>>, vector<1x2x1xf32>
    %271 = vector.shape_cast %270 : vector<1x2x1xf32> to vector<2x1xf32>
    %cst_67 = arith.constant 0.000000e+00 : f32
    %272 = vector.broadcast %cst_67 : f32 to vector<2x1xf32>
    %273 = arith.cmpf ogt, %271, %272 : vector<2x1xf32>
    %c3_68 = arith.constant 3 : index
    %c0_69 = arith.constant 0 : index
    %c0_70 = arith.constant 0 : index
    %274 = vector.load %arg1[%c3_68, %c0_69, %c0_70] : memref<8x2x1xf32, #tpu.memory_space<vmem>>, vector<1x2x1xf32>
    %275 = vector.shape_cast %274 : vector<1x2x1xf32> to vector<2x1xf32>
    %cst_71 = arith.constant 0.000000e+00 : f32
    %276 = vector.broadcast %cst_71 : f32 to vector<2x1xf32>
    %277 = arith.cmpf ogt, %275, %276 : vector<2x1xf32>
    %278 = vector.extract_strided_slice %5 {offsets = [8, 0], sizes = [2, 128], strides = [1, 1]} : vector<16x128xf32> to vector<2x128xf32>
    %cst_72 = arith.constant dense<0.000000e+00> : vector<2x128xf32>
    %279 = tpu.matmul %252, %11, %cst_72 {dimension_numbers = #tpu.dot_dimension_numbers<[1], [0], [0], [1], [0, 0, 1, 1], [], []>} : vector<2x32xf32>, vector<32x128xf32>, vector<2x128xf32> -> vector<2x128xf32>
    %280 = arith.addf %278, %279 : vector<2x128xf32>
    %281 = arith.negf %280 : vector<2x128xf32>
    %282 = math.exp %281 : vector<2x128xf32>
    %cst_73 = arith.constant 1.000000e+00 : f32
    %283 = vector.broadcast %cst_73 : f32 to vector<2x128xf32>
    %284 = arith.addf %283, %282 : vector<2x128xf32>
    %285 = arith.divf %283, %284 : vector<2x128xf32>
    %286 = math.tanh %280 : vector<2x128xf32>
    %287 = vector.extract_strided_slice %285 {offsets = [0, 0], sizes = [2, 32], strides = [1, 1]} : vector<2x128xf32> to vector<2x32xf32>
    %288 = vector.extract_strided_slice %285 {offsets = [0, 32], sizes = [2, 32], strides = [1, 1]} : vector<2x128xf32> to vector<2x32xf32>
    %289 = vector.extract_strided_slice %285 {offsets = [0, 96], sizes = [2, 32], strides = [1, 1]} : vector<2x128xf32> to vector<2x32xf32>
    %290 = vector.extract_strided_slice %286 {offsets = [0, 64], sizes = [2, 32], strides = [1, 1]} : vector<2x128xf32> to vector<2x32xf32>
    %291 = arith.mulf %288, %255 : vector<2x32xf32>
    %292 = arith.mulf %287, %290 : vector<2x32xf32>
    %293 = arith.addf %291, %292 : vector<2x32xf32>
    %294 = math.tanh %293 : vector<2x32xf32>
    %295 = arith.mulf %289, %294 : vector<2x32xf32>
    %296 = vector.extract_strided_slice %10 {offsets = [6, 0], sizes = [2, 128], strides = [1, 1]} : vector<16x128xf32> to vector<2x128xf32>
    %cst_74 = arith.constant dense<0.000000e+00> : vector<2x128xf32>
    %297 = tpu.matmul %258, %12, %cst_74 {dimension_numbers = #tpu.dot_dimension_numbers<[1], [0], [0], [1], [0, 0, 1, 1], [], []>} : vector<2x32xf32>, vector<32x128xf32>, vector<2x128xf32> -> vector<2x128xf32>
    %298 = arith.addf %296, %297 : vector<2x128xf32>
    %299 = arith.negf %298 : vector<2x128xf32>
    %300 = math.exp %299 : vector<2x128xf32>
    %cst_75 = arith.constant 1.000000e+00 : f32
    %301 = vector.broadcast %cst_75 : f32 to vector<2x128xf32>
    %302 = arith.addf %301, %300 : vector<2x128xf32>
    %303 = arith.divf %301, %302 : vector<2x128xf32>
    %304 = math.tanh %298 : vector<2x128xf32>
    %305 = vector.extract_strided_slice %303 {offsets = [0, 0], sizes = [2, 32], strides = [1, 1]} : vector<2x128xf32> to vector<2x32xf32>
    %306 = vector.extract_strided_slice %303 {offsets = [0, 32], sizes = [2, 32], strides = [1, 1]} : vector<2x128xf32> to vector<2x32xf32>
    %307 = vector.extract_strided_slice %303 {offsets = [0, 96], sizes = [2, 32], strides = [1, 1]} : vector<2x128xf32> to vector<2x32xf32>
    %308 = vector.extract_strided_slice %304 {offsets = [0, 64], sizes = [2, 32], strides = [1, 1]} : vector<2x128xf32> to vector<2x32xf32>
    %309 = arith.mulf %306, %261 : vector<2x32xf32>
    %310 = arith.mulf %305, %308 : vector<2x32xf32>
    %311 = arith.addf %309, %310 : vector<2x32xf32>
    %312 = math.tanh %311 : vector<2x32xf32>
    %313 = arith.mulf %307, %312 : vector<2x32xf32>
    %314 = vector.shape_cast %273 : vector<2x1xi1> to vector<2x1xi1>
    %315 = vector.broadcast %314 : vector<2x1xi1> to vector<2x32xi1>
    %316 = arith.select %315, %295, %252 : vector<2x32xi1>, vector<2x32xf32>
    %317 = vector.shape_cast %273 : vector<2x1xi1> to vector<2x1xi1>
    %318 = vector.broadcast %317 : vector<2x1xi1> to vector<2x32xi1>
    %319 = arith.select %318, %293, %255 : vector<2x32xi1>, vector<2x32xf32>
    %320 = vector.shape_cast %277 : vector<2x1xi1> to vector<2x1xi1>
    %321 = vector.broadcast %320 : vector<2x1xi1> to vector<2x32xi1>
    %322 = arith.select %321, %313, %258 : vector<2x32xi1>, vector<2x32xf32>
    %323 = vector.shape_cast %277 : vector<2x1xi1> to vector<2x1xi1>
    %324 = vector.broadcast %323 : vector<2x1xi1> to vector<2x32xi1>
    %325 = arith.select %324, %311, %261 : vector<2x32xi1>, vector<2x32xf32>
    %cst_76 = arith.constant 0.000000e+00 : f32
    %326 = vector.shape_cast %273 : vector<2x1xi1> to vector<2x1xi1>
    %327 = vector.broadcast %326 : vector<2x1xi1> to vector<2x32xi1>
    %328 = vector.broadcast %cst_76 : f32 to vector<2x32xf32>
    %329 = arith.select %327, %295, %328 : vector<2x32xi1>, vector<2x32xf32>
    %cst_77 = arith.constant 0.000000e+00 : f32
    %330 = vector.shape_cast %277 : vector<2x1xi1> to vector<2x1xi1>
    %331 = vector.broadcast %330 : vector<2x1xi1> to vector<2x32xi1>
    %332 = vector.broadcast %cst_77 : f32 to vector<2x32xf32>
    %333 = arith.select %331, %313, %332 : vector<2x32xi1>, vector<2x32xf32>
    %c5_78 = arith.constant 5 : index
    %c0_79 = arith.constant 0 : index
    %c0_80 = arith.constant 0 : index
    %334 = vector.load %arg1[%c5_78, %c0_79, %c0_80] : memref<8x2x1xf32, #tpu.memory_space<vmem>>, vector<1x2x1xf32>
    %335 = vector.shape_cast %334 : vector<1x2x1xf32> to vector<2x1xf32>
    %cst_81 = arith.constant 0.000000e+00 : f32
    %336 = vector.broadcast %cst_81 : f32 to vector<2x1xf32>
    %337 = arith.cmpf ogt, %335, %336 : vector<2x1xf32>
    %c2_82 = arith.constant 2 : index
    %c0_83 = arith.constant 0 : index
    %c0_84 = arith.constant 0 : index
    %338 = vector.load %arg1[%c2_82, %c0_83, %c0_84] : memref<8x2x1xf32, #tpu.memory_space<vmem>>, vector<1x2x1xf32>
    %339 = vector.shape_cast %338 : vector<1x2x1xf32> to vector<2x1xf32>
    %cst_85 = arith.constant 0.000000e+00 : f32
    %340 = vector.broadcast %cst_85 : f32 to vector<2x1xf32>
    %341 = arith.cmpf ogt, %339, %340 : vector<2x1xf32>
    %342 = vector.extract_strided_slice %5 {offsets = [10, 0], sizes = [2, 128], strides = [1, 1]} : vector<16x128xf32> to vector<2x128xf32>
    %cst_86 = arith.constant dense<0.000000e+00> : vector<2x128xf32>
    %343 = tpu.matmul %316, %11, %cst_86 {dimension_numbers = #tpu.dot_dimension_numbers<[1], [0], [0], [1], [0, 0, 1, 1], [], []>} : vector<2x32xf32>, vector<32x128xf32>, vector<2x128xf32> -> vector<2x128xf32>
    %344 = arith.addf %342, %343 : vector<2x128xf32>
    %345 = arith.negf %344 : vector<2x128xf32>
    %346 = math.exp %345 : vector<2x128xf32>
    %cst_87 = arith.constant 1.000000e+00 : f32
    %347 = vector.broadcast %cst_87 : f32 to vector<2x128xf32>
    %348 = arith.addf %347, %346 : vector<2x128xf32>
    %349 = arith.divf %347, %348 : vector<2x128xf32>
    %350 = math.tanh %344 : vector<2x128xf32>
    %351 = vector.extract_strided_slice %349 {offsets = [0, 0], sizes = [2, 32], strides = [1, 1]} : vector<2x128xf32> to vector<2x32xf32>
    %352 = vector.extract_strided_slice %349 {offsets = [0, 32], sizes = [2, 32], strides = [1, 1]} : vector<2x128xf32> to vector<2x32xf32>
    %353 = vector.extract_strided_slice %349 {offsets = [0, 96], sizes = [2, 32], strides = [1, 1]} : vector<2x128xf32> to vector<2x32xf32>
    %354 = vector.extract_strided_slice %350 {offsets = [0, 64], sizes = [2, 32], strides = [1, 1]} : vector<2x128xf32> to vector<2x32xf32>
    %355 = arith.mulf %352, %319 : vector<2x32xf32>
    %356 = arith.mulf %351, %354 : vector<2x32xf32>
    %357 = arith.addf %355, %356 : vector<2x32xf32>
    %358 = math.tanh %357 : vector<2x32xf32>
    %359 = arith.mulf %353, %358 : vector<2x32xf32>
    %360 = vector.extract_strided_slice %10 {offsets = [4, 0], sizes = [2, 128], strides = [1, 1]} : vector<16x128xf32> to vector<2x128xf32>
    %cst_88 = arith.constant dense<0.000000e+00> : vector<2x128xf32>
    %361 = tpu.matmul %322, %12, %cst_88 {dimension_numbers = #tpu.dot_dimension_numbers<[1], [0], [0], [1], [0, 0, 1, 1], [], []>} : vector<2x32xf32>, vector<32x128xf32>, vector<2x128xf32> -> vector<2x128xf32>
    %362 = arith.addf %360, %361 : vector<2x128xf32>
    %363 = arith.negf %362 : vector<2x128xf32>
    %364 = math.exp %363 : vector<2x128xf32>
    %cst_89 = arith.constant 1.000000e+00 : f32
    %365 = vector.broadcast %cst_89 : f32 to vector<2x128xf32>
    %366 = arith.addf %365, %364 : vector<2x128xf32>
    %367 = arith.divf %365, %366 : vector<2x128xf32>
    %368 = math.tanh %362 : vector<2x128xf32>
    %369 = vector.extract_strided_slice %367 {offsets = [0, 0], sizes = [2, 32], strides = [1, 1]} : vector<2x128xf32> to vector<2x32xf32>
    %370 = vector.extract_strided_slice %367 {offsets = [0, 32], sizes = [2, 32], strides = [1, 1]} : vector<2x128xf32> to vector<2x32xf32>
    %371 = vector.extract_strided_slice %367 {offsets = [0, 96], sizes = [2, 32], strides = [1, 1]} : vector<2x128xf32> to vector<2x32xf32>
    %372 = vector.extract_strided_slice %368 {offsets = [0, 64], sizes = [2, 32], strides = [1, 1]} : vector<2x128xf32> to vector<2x32xf32>
    %373 = arith.mulf %370, %325 : vector<2x32xf32>
    %374 = arith.mulf %369, %372 : vector<2x32xf32>
    %375 = arith.addf %373, %374 : vector<2x32xf32>
    %376 = math.tanh %375 : vector<2x32xf32>
    %377 = arith.mulf %371, %376 : vector<2x32xf32>
    %378 = vector.shape_cast %337 : vector<2x1xi1> to vector<2x1xi1>
    %379 = vector.broadcast %378 : vector<2x1xi1> to vector<2x32xi1>
    %380 = arith.select %379, %359, %316 : vector<2x32xi1>, vector<2x32xf32>
    %381 = vector.shape_cast %337 : vector<2x1xi1> to vector<2x1xi1>
    %382 = vector.broadcast %381 : vector<2x1xi1> to vector<2x32xi1>
    %383 = arith.select %382, %357, %319 : vector<2x32xi1>, vector<2x32xf32>
    %384 = vector.shape_cast %341 : vector<2x1xi1> to vector<2x1xi1>
    %385 = vector.broadcast %384 : vector<2x1xi1> to vector<2x32xi1>
    %386 = arith.select %385, %377, %322 : vector<2x32xi1>, vector<2x32xf32>
    %387 = vector.shape_cast %341 : vector<2x1xi1> to vector<2x1xi1>
    %388 = vector.broadcast %387 : vector<2x1xi1> to vector<2x32xi1>
    %389 = arith.select %388, %375, %325 : vector<2x32xi1>, vector<2x32xf32>
    %cst_90 = arith.constant 0.000000e+00 : f32
    %390 = vector.shape_cast %337 : vector<2x1xi1> to vector<2x1xi1>
    %391 = vector.broadcast %390 : vector<2x1xi1> to vector<2x32xi1>
    %392 = vector.broadcast %cst_90 : f32 to vector<2x32xf32>
    %393 = arith.select %391, %359, %392 : vector<2x32xi1>, vector<2x32xf32>
    %cst_91 = arith.constant 0.000000e+00 : f32
    %394 = vector.shape_cast %341 : vector<2x1xi1> to vector<2x1xi1>
    %395 = vector.broadcast %394 : vector<2x1xi1> to vector<2x32xi1>
    %396 = vector.broadcast %cst_91 : f32 to vector<2x32xf32>
    %397 = arith.select %395, %377, %396 : vector<2x32xi1>, vector<2x32xf32>
    %c6_92 = arith.constant 6 : index
    %c0_93 = arith.constant 0 : index
    %c0_94 = arith.constant 0 : index
    %398 = vector.load %arg1[%c6_92, %c0_93, %c0_94] : memref<8x2x1xf32, #tpu.memory_space<vmem>>, vector<1x2x1xf32>
    %399 = vector.shape_cast %398 : vector<1x2x1xf32> to vector<2x1xf32>
    %cst_95 = arith.constant 0.000000e+00 : f32
    %400 = vector.broadcast %cst_95 : f32 to vector<2x1xf32>
    %401 = arith.cmpf ogt, %399, %400 : vector<2x1xf32>
    %c1_96 = arith.constant 1 : index
    %c0_97 = arith.constant 0 : index
    %c0_98 = arith.constant 0 : index
    %402 = vector.load %arg1[%c1_96, %c0_97, %c0_98] : memref<8x2x1xf32, #tpu.memory_space<vmem>>, vector<1x2x1xf32>
    %403 = vector.shape_cast %402 : vector<1x2x1xf32> to vector<2x1xf32>
    %cst_99 = arith.constant 0.000000e+00 : f32
    %404 = vector.broadcast %cst_99 : f32 to vector<2x1xf32>
    %405 = arith.cmpf ogt, %403, %404 : vector<2x1xf32>
    %406 = vector.extract_strided_slice %5 {offsets = [12, 0], sizes = [2, 128], strides = [1, 1]} : vector<16x128xf32> to vector<2x128xf32>
    %cst_100 = arith.constant dense<0.000000e+00> : vector<2x128xf32>
    %407 = tpu.matmul %380, %11, %cst_100 {dimension_numbers = #tpu.dot_dimension_numbers<[1], [0], [0], [1], [0, 0, 1, 1], [], []>} : vector<2x32xf32>, vector<32x128xf32>, vector<2x128xf32> -> vector<2x128xf32>
    %408 = arith.addf %406, %407 : vector<2x128xf32>
    %409 = arith.negf %408 : vector<2x128xf32>
    %410 = math.exp %409 : vector<2x128xf32>
    %cst_101 = arith.constant 1.000000e+00 : f32
    %411 = vector.broadcast %cst_101 : f32 to vector<2x128xf32>
    %412 = arith.addf %411, %410 : vector<2x128xf32>
    %413 = arith.divf %411, %412 : vector<2x128xf32>
    %414 = math.tanh %408 : vector<2x128xf32>
    %415 = vector.extract_strided_slice %413 {offsets = [0, 0], sizes = [2, 32], strides = [1, 1]} : vector<2x128xf32> to vector<2x32xf32>
    %416 = vector.extract_strided_slice %413 {offsets = [0, 32], sizes = [2, 32], strides = [1, 1]} : vector<2x128xf32> to vector<2x32xf32>
    %417 = vector.extract_strided_slice %413 {offsets = [0, 96], sizes = [2, 32], strides = [1, 1]} : vector<2x128xf32> to vector<2x32xf32>
    %418 = vector.extract_strided_slice %414 {offsets = [0, 64], sizes = [2, 32], strides = [1, 1]} : vector<2x128xf32> to vector<2x32xf32>
    %419 = arith.mulf %416, %383 : vector<2x32xf32>
    %420 = arith.mulf %415, %418 : vector<2x32xf32>
    %421 = arith.addf %419, %420 : vector<2x32xf32>
    %422 = math.tanh %421 : vector<2x32xf32>
    %423 = arith.mulf %417, %422 : vector<2x32xf32>
    %424 = vector.extract_strided_slice %10 {offsets = [2, 0], sizes = [2, 128], strides = [1, 1]} : vector<16x128xf32> to vector<2x128xf32>
    %cst_102 = arith.constant dense<0.000000e+00> : vector<2x128xf32>
    %425 = tpu.matmul %386, %12, %cst_102 {dimension_numbers = #tpu.dot_dimension_numbers<[1], [0], [0], [1], [0, 0, 1, 1], [], []>} : vector<2x32xf32>, vector<32x128xf32>, vector<2x128xf32> -> vector<2x128xf32>
    %426 = arith.addf %424, %425 : vector<2x128xf32>
    %427 = arith.negf %426 : vector<2x128xf32>
    %428 = math.exp %427 : vector<2x128xf32>
    %cst_103 = arith.constant 1.000000e+00 : f32
    %429 = vector.broadcast %cst_103 : f32 to vector<2x128xf32>
    %430 = arith.addf %429, %428 : vector<2x128xf32>
    %431 = arith.divf %429, %430 : vector<2x128xf32>
    %432 = math.tanh %426 : vector<2x128xf32>
    %433 = vector.extract_strided_slice %431 {offsets = [0, 0], sizes = [2, 32], strides = [1, 1]} : vector<2x128xf32> to vector<2x32xf32>
    %434 = vector.extract_strided_slice %431 {offsets = [0, 32], sizes = [2, 32], strides = [1, 1]} : vector<2x128xf32> to vector<2x32xf32>
    %435 = vector.extract_strided_slice %431 {offsets = [0, 96], sizes = [2, 32], strides = [1, 1]} : vector<2x128xf32> to vector<2x32xf32>
    %436 = vector.extract_strided_slice %432 {offsets = [0, 64], sizes = [2, 32], strides = [1, 1]} : vector<2x128xf32> to vector<2x32xf32>
    %437 = arith.mulf %434, %389 : vector<2x32xf32>
    %438 = arith.mulf %433, %436 : vector<2x32xf32>
    %439 = arith.addf %437, %438 : vector<2x32xf32>
    %440 = math.tanh %439 : vector<2x32xf32>
    %441 = arith.mulf %435, %440 : vector<2x32xf32>
    %442 = vector.shape_cast %401 : vector<2x1xi1> to vector<2x1xi1>
    %443 = vector.broadcast %442 : vector<2x1xi1> to vector<2x32xi1>
    %444 = arith.select %443, %423, %380 : vector<2x32xi1>, vector<2x32xf32>
    %445 = vector.shape_cast %401 : vector<2x1xi1> to vector<2x1xi1>
    %446 = vector.broadcast %445 : vector<2x1xi1> to vector<2x32xi1>
    %447 = arith.select %446, %421, %383 : vector<2x32xi1>, vector<2x32xf32>
    %448 = vector.shape_cast %405 : vector<2x1xi1> to vector<2x1xi1>
    %449 = vector.broadcast %448 : vector<2x1xi1> to vector<2x32xi1>
    %450 = arith.select %449, %441, %386 : vector<2x32xi1>, vector<2x32xf32>
    %451 = vector.shape_cast %405 : vector<2x1xi1> to vector<2x1xi1>
    %452 = vector.broadcast %451 : vector<2x1xi1> to vector<2x32xi1>
    %453 = arith.select %452, %439, %389 : vector<2x32xi1>, vector<2x32xf32>
    %cst_104 = arith.constant 0.000000e+00 : f32
    %454 = vector.shape_cast %401 : vector<2x1xi1> to vector<2x1xi1>
    %455 = vector.broadcast %454 : vector<2x1xi1> to vector<2x32xi1>
    %456 = vector.broadcast %cst_104 : f32 to vector<2x32xf32>
    %457 = arith.select %455, %423, %456 : vector<2x32xi1>, vector<2x32xf32>
    %cst_105 = arith.constant 0.000000e+00 : f32
    %458 = vector.shape_cast %405 : vector<2x1xi1> to vector<2x1xi1>
    %459 = vector.broadcast %458 : vector<2x1xi1> to vector<2x32xi1>
    %460 = vector.broadcast %cst_105 : f32 to vector<2x32xf32>
    %461 = arith.select %459, %441, %460 : vector<2x32xi1>, vector<2x32xf32>
    %c7_106 = arith.constant 7 : index
    %c0_107 = arith.constant 0 : index
    %c0_108 = arith.constant 0 : index
    %462 = vector.load %arg1[%c7_106, %c0_107, %c0_108] : memref<8x2x1xf32, #tpu.memory_space<vmem>>, vector<1x2x1xf32>
    %463 = vector.shape_cast %462 : vector<1x2x1xf32> to vector<2x1xf32>
    %cst_109 = arith.constant 0.000000e+00 : f32
    %464 = vector.broadcast %cst_109 : f32 to vector<2x1xf32>
    %465 = arith.cmpf ogt, %463, %464 : vector<2x1xf32>
    %c0_110 = arith.constant 0 : index
    %c0_111 = arith.constant 0 : index
    %c0_112 = arith.constant 0 : index
    %466 = vector.load %arg1[%c0_110, %c0_111, %c0_112] : memref<8x2x1xf32, #tpu.memory_space<vmem>>, vector<1x2x1xf32>
    %467 = vector.shape_cast %466 : vector<1x2x1xf32> to vector<2x1xf32>
    %cst_113 = arith.constant 0.000000e+00 : f32
    %468 = vector.broadcast %cst_113 : f32 to vector<2x1xf32>
    %469 = arith.cmpf ogt, %467, %468 : vector<2x1xf32>
    %470 = vector.extract_strided_slice %5 {offsets = [14, 0], sizes = [2, 128], strides = [1, 1]} : vector<16x128xf32> to vector<2x128xf32>
    %cst_114 = arith.constant dense<0.000000e+00> : vector<2x128xf32>
    %471 = tpu.matmul %444, %11, %cst_114 {dimension_numbers = #tpu.dot_dimension_numbers<[1], [0], [0], [1], [0, 0, 1, 1], [], []>} : vector<2x32xf32>, vector<32x128xf32>, vector<2x128xf32> -> vector<2x128xf32>
    %472 = arith.addf %470, %471 : vector<2x128xf32>
    %473 = arith.negf %472 : vector<2x128xf32>
    %474 = math.exp %473 : vector<2x128xf32>
    %cst_115 = arith.constant 1.000000e+00 : f32
    %475 = vector.broadcast %cst_115 : f32 to vector<2x128xf32>
    %476 = arith.addf %475, %474 : vector<2x128xf32>
    %477 = arith.divf %475, %476 : vector<2x128xf32>
    %478 = math.tanh %472 : vector<2x128xf32>
    %479 = vector.extract_strided_slice %477 {offsets = [0, 0], sizes = [2, 32], strides = [1, 1]} : vector<2x128xf32> to vector<2x32xf32>
    %480 = vector.extract_strided_slice %477 {offsets = [0, 32], sizes = [2, 32], strides = [1, 1]} : vector<2x128xf32> to vector<2x32xf32>
    %481 = vector.extract_strided_slice %477 {offsets = [0, 96], sizes = [2, 32], strides = [1, 1]} : vector<2x128xf32> to vector<2x32xf32>
    %482 = vector.extract_strided_slice %478 {offsets = [0, 64], sizes = [2, 32], strides = [1, 1]} : vector<2x128xf32> to vector<2x32xf32>
    %483 = arith.mulf %480, %447 : vector<2x32xf32>
    %484 = arith.mulf %479, %482 : vector<2x32xf32>
    %485 = arith.addf %483, %484 : vector<2x32xf32>
    %486 = math.tanh %485 : vector<2x32xf32>
    %487 = arith.mulf %481, %486 : vector<2x32xf32>
    %488 = vector.extract_strided_slice %10 {offsets = [0, 0], sizes = [2, 128], strides = [1, 1]} : vector<16x128xf32> to vector<2x128xf32>
    %cst_116 = arith.constant dense<0.000000e+00> : vector<2x128xf32>
    %489 = tpu.matmul %450, %12, %cst_116 {dimension_numbers = #tpu.dot_dimension_numbers<[1], [0], [0], [1], [0, 0, 1, 1], [], []>} : vector<2x32xf32>, vector<32x128xf32>, vector<2x128xf32> -> vector<2x128xf32>
    %490 = arith.addf %488, %489 : vector<2x128xf32>
    %491 = arith.negf %490 : vector<2x128xf32>
    %492 = math.exp %491 : vector<2x128xf32>
    %cst_117 = arith.constant 1.000000e+00 : f32
    %493 = vector.broadcast %cst_117 : f32 to vector<2x128xf32>
    %494 = arith.addf %493, %492 : vector<2x128xf32>
    %495 = arith.divf %493, %494 : vector<2x128xf32>
    %496 = math.tanh %490 : vector<2x128xf32>
    %497 = vector.extract_strided_slice %495 {offsets = [0, 0], sizes = [2, 32], strides = [1, 1]} : vector<2x128xf32> to vector<2x32xf32>
    %498 = vector.extract_strided_slice %495 {offsets = [0, 32], sizes = [2, 32], strides = [1, 1]} : vector<2x128xf32> to vector<2x32xf32>
    %499 = vector.extract_strided_slice %495 {offsets = [0, 96], sizes = [2, 32], strides = [1, 1]} : vector<2x128xf32> to vector<2x32xf32>
    %500 = vector.extract_strided_slice %496 {offsets = [0, 64], sizes = [2, 32], strides = [1, 1]} : vector<2x128xf32> to vector<2x32xf32>
    %501 = arith.mulf %498, %453 : vector<2x32xf32>
    %502 = arith.mulf %497, %500 : vector<2x32xf32>
    %503 = arith.addf %501, %502 : vector<2x32xf32>
    %504 = math.tanh %503 : vector<2x32xf32>
    %505 = arith.mulf %499, %504 : vector<2x32xf32>
    %506 = vector.shape_cast %465 : vector<2x1xi1> to vector<2x1xi1>
    %507 = vector.broadcast %506 : vector<2x1xi1> to vector<2x32xi1>
    %508 = arith.select %507, %487, %444 : vector<2x32xi1>, vector<2x32xf32>
    %509 = vector.shape_cast %465 : vector<2x1xi1> to vector<2x1xi1>
    %510 = vector.broadcast %509 : vector<2x1xi1> to vector<2x32xi1>
    %511 = arith.select %510, %485, %447 : vector<2x32xi1>, vector<2x32xf32>
    %512 = vector.shape_cast %469 : vector<2x1xi1> to vector<2x1xi1>
    %513 = vector.broadcast %512 : vector<2x1xi1> to vector<2x32xi1>
    %514 = arith.select %513, %505, %450 : vector<2x32xi1>, vector<2x32xf32>
    %515 = vector.shape_cast %469 : vector<2x1xi1> to vector<2x1xi1>
    %516 = vector.broadcast %515 : vector<2x1xi1> to vector<2x32xi1>
    %517 = arith.select %516, %503, %453 : vector<2x32xi1>, vector<2x32xf32>
    %cst_118 = arith.constant 0.000000e+00 : f32
    %518 = vector.shape_cast %465 : vector<2x1xi1> to vector<2x1xi1>
    %519 = vector.broadcast %518 : vector<2x1xi1> to vector<2x32xi1>
    %520 = vector.broadcast %cst_118 : f32 to vector<2x32xf32>
    %521 = arith.select %519, %487, %520 : vector<2x32xi1>, vector<2x32xf32>
    %cst_119 = arith.constant 0.000000e+00 : f32
    %522 = vector.shape_cast %469 : vector<2x1xi1> to vector<2x1xi1>
    %523 = vector.broadcast %522 : vector<2x1xi1> to vector<2x32xi1>
    %524 = vector.broadcast %cst_119 : f32 to vector<2x32xf32>
    %525 = arith.select %523, %505, %524 : vector<2x32xi1>, vector<2x32xf32>
    %c0_120 = arith.constant 0 : index
    %c0_121 = arith.constant 0 : index
    %c0_122 = arith.constant 0 : index
    %526 = vector.load %arg11[%c0_120, %c0_121, %c0_122] : memref<2x2x32xf32, #tpu.memory_space<vmem>>, vector<1x2x32xf32>
    %527 = vector.shape_cast %526 : vector<1x2x32xf32> to vector<2x32xf32>
    %528 = vector.shape_cast %508 : vector<2x32xf32> to vector<1x2x32xf32>
    tpu.vector_store %arg11[%c0_120, %c0_121, %c0_122], %528 {strides = array<i32>} : memref<2x2x32xf32, #tpu.memory_space<vmem>>, vector<1x2x32xf32>,
    %c1_123 = arith.constant 1 : index
    %c0_124 = arith.constant 0 : index
    %c0_125 = arith.constant 0 : index
    %529 = vector.load %arg11[%c1_123, %c0_124, %c0_125] : memref<2x2x32xf32, #tpu.memory_space<vmem>>, vector<1x2x32xf32>
    %530 = vector.shape_cast %529 : vector<1x2x32xf32> to vector<2x32xf32>
    %531 = vector.shape_cast %514 : vector<2x32xf32> to vector<1x2x32xf32>
    tpu.vector_store %arg11[%c1_123, %c0_124, %c0_125], %531 {strides = array<i32>} : memref<2x2x32xf32, #tpu.memory_space<vmem>>, vector<1x2x32xf32>,
    %c0_126 = arith.constant 0 : index
    %c0_127 = arith.constant 0 : index
    %c0_128 = arith.constant 0 : index
    %532 = vector.load %arg12[%c0_126, %c0_127, %c0_128] : memref<2x2x32xf32, #tpu.memory_space<vmem>>, vector<1x2x32xf32>
    %533 = vector.shape_cast %532 : vector<1x2x32xf32> to vector<2x32xf32>
    %534 = vector.shape_cast %511 : vector<2x32xf32> to vector<1x2x32xf32>
    tpu.vector_store %arg12[%c0_126, %c0_127, %c0_128], %534 {strides = array<i32>} : memref<2x2x32xf32, #tpu.memory_space<vmem>>, vector<1x2x32xf32>,
    %c1_129 = arith.constant 1 : index
    %c0_130 = arith.constant 0 : index
    %c0_131 = arith.constant 0 : index
    %535 = vector.load %arg12[%c1_129, %c0_130, %c0_131] : memref<2x2x32xf32, #tpu.memory_space<vmem>>, vector<1x2x32xf32>
    %536 = vector.shape_cast %535 : vector<1x2x32xf32> to vector<2x32xf32>
    %537 = vector.shape_cast %517 : vector<2x32xf32> to vector<1x2x32xf32>
    tpu.vector_store %arg12[%c1_129, %c0_130, %c0_131], %537 {strides = array<i32>} : memref<2x2x32xf32, #tpu.memory_space<vmem>>, vector<1x2x32xf32>,
    %538 = vector.extract_strided_slice %73 {offsets = [0, 0], sizes = [1, 32], strides = [1, 1]} : vector<2x32xf32> to vector<1x32xf32>
    %539 = vector.extract_strided_slice %137 {offsets = [0, 0], sizes = [1, 32], strides = [1, 1]} : vector<2x32xf32> to vector<1x32xf32>
    %540 = vector.extract_strided_slice %201 {offsets = [0, 0], sizes = [1, 32], strides = [1, 1]} : vector<2x32xf32> to vector<1x32xf32>
    %541 = vector.extract_strided_slice %265 {offsets = [0, 0], sizes = [1, 32], strides = [1, 1]} : vector<2x32xf32> to vector<1x32xf32>
    %542 = vector.extract_strided_slice %329 {offsets = [0, 0], sizes = [1, 32], strides = [1, 1]} : vector<2x32xf32> to vector<1x32xf32>
    %543 = vector.extract_strided_slice %393 {offsets = [0, 0], sizes = [1, 32], strides = [1, 1]} : vector<2x32xf32> to vector<1x32xf32>
    %544 = vector.extract_strided_slice %457 {offsets = [0, 0], sizes = [1, 32], strides = [1, 1]} : vector<2x32xf32> to vector<1x32xf32>
    %545 = vector.extract_strided_slice %521 {offsets = [0, 0], sizes = [1, 32], strides = [1, 1]} : vector<2x32xf32> to vector<1x32xf32>
    %546 = tpu.concatenate %538, %539, %540, %541, %542, %543, %544, %545 in 0 : vector<1x32xf32>, vector<1x32xf32>, vector<1x32xf32>, vector<1x32xf32>, vector<1x32xf32>, vector<1x32xf32>, vector<1x32xf32>, vector<1x32xf32> -> vector<8x32xf32>
    %547 = vector.extract_strided_slice %525 {offsets = [0, 0], sizes = [1, 32], strides = [1, 1]} : vector<2x32xf32> to vector<1x32xf32>
    %548 = vector.extract_strided_slice %461 {offsets = [0, 0], sizes = [1, 32], strides = [1, 1]} : vector<2x32xf32> to vector<1x32xf32>
    %549 = vector.extract_strided_slice %397 {offsets = [0, 0], sizes = [1, 32], strides = [1, 1]} : vector<2x32xf32> to vector<1x32xf32>
    %550 = vector.extract_strided_slice %333 {offsets = [0, 0], sizes = [1, 32], strides = [1, 1]} : vector<2x32xf32> to vector<1x32xf32>
    %551 = vector.extract_strided_slice %269 {offsets = [0, 0], sizes = [1, 32], strides = [1, 1]} : vector<2x32xf32> to vector<1x32xf32>
    %552 = vector.extract_strided_slice %205 {offsets = [0, 0], sizes = [1, 32], strides = [1, 1]} : vector<2x32xf32> to vector<1x32xf32>
    %553 = vector.extract_strided_slice %141 {offsets = [0, 0], sizes = [1, 32], strides = [1, 1]} : vector<2x32xf32> to vector<1x32xf32>
    %554 = vector.extract_strided_slice %77 {offsets = [0, 0], sizes = [1, 32], strides = [1, 1]} : vector<2x32xf32> to vector<1x32xf32>
    %555 = tpu.concatenate %547, %548, %549, %550, %551, %552, %553, %554 in 0 : vector<1x32xf32>, vector<1x32xf32>, vector<1x32xf32>, vector<1x32xf32>, vector<1x32xf32>, vector<1x32xf32>, vector<1x32xf32>, vector<1x32xf32> -> vector<8x32xf32>
    %556 = tpu.concatenate %546, %555 in 1 : vector<8x32xf32>, vector<8x32xf32> -> vector<8x64xf32>
    %557 = vector.extract_strided_slice %73 {offsets = [1, 0], sizes = [1, 32], strides = [1, 1]} : vector<2x32xf32> to vector<1x32xf32>
    %558 = vector.extract_strided_slice %137 {offsets = [1, 0], sizes = [1, 32], strides = [1, 1]} : vector<2x32xf32> to vector<1x32xf32>
    %559 = vector.extract_strided_slice %201 {offsets = [1, 0], sizes = [1, 32], strides = [1, 1]} : vector<2x32xf32> to vector<1x32xf32>
    %560 = vector.extract_strided_slice %265 {offsets = [1, 0], sizes = [1, 32], strides = [1, 1]} : vector<2x32xf32> to vector<1x32xf32>
    %561 = vector.extract_strided_slice %329 {offsets = [1, 0], sizes = [1, 32], strides = [1, 1]} : vector<2x32xf32> to vector<1x32xf32>
    %562 = vector.extract_strided_slice %393 {offsets = [1, 0], sizes = [1, 32], strides = [1, 1]} : vector<2x32xf32> to vector<1x32xf32>
    %563 = vector.extract_strided_slice %457 {offsets = [1, 0], sizes = [1, 32], strides = [1, 1]} : vector<2x32xf32> to vector<1x32xf32>
    %564 = vector.extract_strided_slice %521 {offsets = [1, 0], sizes = [1, 32], strides = [1, 1]} : vector<2x32xf32> to vector<1x32xf32>
    %565 = tpu.concatenate %557, %558, %559, %560, %561, %562, %563, %564 in 0 : vector<1x32xf32>, vector<1x32xf32>, vector<1x32xf32>, vector<1x32xf32>, vector<1x32xf32>, vector<1x32xf32>, vector<1x32xf32>, vector<1x32xf32> -> vector<8x32xf32>
    %566 = vector.extract_strided_slice %525 {offsets = [1, 0], sizes = [1, 32], strides = [1, 1]} : vector<2x32xf32> to vector<1x32xf32>
    %567 = vector.extract_strided_slice %461 {offsets = [1, 0], sizes = [1, 32], strides = [1, 1]} : vector<2x32xf32> to vector<1x32xf32>
    %568 = vector.extract_strided_slice %397 {offsets = [1, 0], sizes = [1, 32], strides = [1, 1]} : vector<2x32xf32> to vector<1x32xf32>
    %569 = vector.extract_strided_slice %333 {offsets = [1, 0], sizes = [1, 32], strides = [1, 1]} : vector<2x32xf32> to vector<1x32xf32>
    %570 = vector.extract_strided_slice %269 {offsets = [1, 0], sizes = [1, 32], strides = [1, 1]} : vector<2x32xf32> to vector<1x32xf32>
    %571 = vector.extract_strided_slice %205 {offsets = [1, 0], sizes = [1, 32], strides = [1, 1]} : vector<2x32xf32> to vector<1x32xf32>
    %572 = vector.extract_strided_slice %141 {offsets = [1, 0], sizes = [1, 32], strides = [1, 1]} : vector<2x32xf32> to vector<1x32xf32>
    %573 = vector.extract_strided_slice %77 {offsets = [1, 0], sizes = [1, 32], strides = [1, 1]} : vector<2x32xf32> to vector<1x32xf32>
    %574 = tpu.concatenate %566, %567, %568, %569, %570, %571, %572, %573 in 0 : vector<1x32xf32>, vector<1x32xf32>, vector<1x32xf32>, vector<1x32xf32>, vector<1x32xf32>, vector<1x32xf32>, vector<1x32xf32>, vector<1x32xf32> -> vector<8x32xf32>
    %575 = tpu.concatenate %565, %574 in 1 : vector<8x32xf32>, vector<8x32xf32> -> vector<8x64xf32>
    %576 = tpu.concatenate %556, %575 in 0 : vector<8x64xf32>, vector<8x64xf32> -> vector<16x64xf32>
    %c0_132 = arith.constant 0 : index
    %c0_133 = arith.constant 0 : index
    %577 = vector.load %arg9[%c0_132, %c0_133] : memref<16x64xf32, #tpu.memory_space<vmem>>, vector<16x64xf32>
    tpu.vector_store %arg9[%c0_132, %c0_133], %576 {strides = array<i32>} : memref<16x64xf32, #tpu.memory_space<vmem>>, vector<16x64xf32>,
    %c0_134 = arith.constant 0 : index
    %c0_135 = arith.constant 0 : index
    %578 = vector.load %arg8[%c0_134, %c0_135] : memref<64x64xf32, #tpu.memory_space<vmem>>, vector<64x64xf32>
    %cst_136 = arith.constant dense<0.000000e+00> : vector<16x64xf32>
    %579 = tpu.matmul %576, %578, %cst_136 {dimension_numbers = #tpu.dot_dimension_numbers<[1], [0], [0], [1], [0, 0, 1, 1], [], []>} : vector<16x64xf32>, vector<64x64xf32>, vector<16x64xf32> -> vector<16x64xf32>
    %c0_137 = arith.constant 0 : index
    %c0_138 = arith.constant 0 : index
    %580 = vector.load %arg10[%c0_137, %c0_138] : memref<16x64xf32, #tpu.memory_space<vmem>>, vector<16x64xf32>
    tpu.vector_store %arg10[%c0_137, %c0_138], %579 {strides = array<i32>} : memref<16x64xf32, #tpu.memory_space<vmem>>, vector<16x64xf32>,
    return
  }
}

</mosaic_0001>

<bundles_post_ra>
// kernel: tpu_custom_call.1
= control target key start
LH: loop header
LB: loop body
LE: loop exit
PB: predicated region body
PF: predicated region fallthrough
CT: control target
= control target key end

     0   :  { %18 = vsyncpa [#allocation3], 0  ;;  %s3016_s0 = inlined_call_operand.vmem [shape: f32[16,32], index: 0, kind: input, shape index: {}]   ;;  %s3017_s1 = inlined_call_operand.vmem [shape: f32[8,2,1], index: 1, kind: input, shape index: {}]   ;;  %s3018_s2 = inlined_call_operand.hbm [shape: f32[32,128], index: 2, kind: input, shape index: {}]   ;;  %s3019_s3 = inlined_call_operand.hbm [shape: f32[32,128], index: 3, kind: input, shape index: {}]   ;;  %s3020_s4 = inlined_call_operand.vmem [shape: f32[1,128], index: 4, kind: input, shape index: {}]   ;;  %s3021_s5 = inlined_call_operand.hbm [shape: f32[32,128], index: 5, kind: input, shape index: {}]   ;;  %s3022_s6 = inlined_call_operand.hbm [shape: f32[32,128], index: 6, kind: input, shape index: {}]   ;;  %s3023_s7 = inlined_call_operand.vmem [shape: f32[1,128], index: 7, kind: input, shape index: {}]   ;;  %s3024_s8 = inlined_call_operand.hbm [shape: f32[64,64], index: 8, kind: input, shape index: {}]   ;;  %s3025_s9 = inlined_call_operand.hbm [shape: f32[16,64], index: 9, kind: output, shape index: {0}]   ;;  %s3026_s10 = inlined_call_operand.hbm [shape: f32[16,64], index: 10, kind: output, shape index: {1}]   ;;  %s3027_s11 = inlined_call_operand.hbm [shape: f32[2,2,32], index: 11, kind: output, shape index: {2}]   ;;  %s3028_s12 = inlined_call_operand.hbm [shape: f32[2,2,32], index: 12, kind: output, shape index: {3}]  }
   0x1   :  { %19 = vsyncpa [#allocation6], 0 }
   0x2   :  { %20 = vsyncpa [#allocation9], 0 }
   0x3   :  { %21 = vsyncpa [#allocation4], 0 }
   0x4   :  { %22 = vsyncpa [#allocation13], 0 }
   0x5   :  { %23 = vsyncpa [#allocation16], 0  ;;  %s45_s23 = sshll.u32 %s3019_s3, 4  ;;  %s2251_s24 = smov [#allocation5]   ;;  %s46_s23 = int_to_ptr.hbm [resolvable:$true] %s45_s23 }
   0x6   :  { %s47_s25 = sshll.u32 %s2251_s24, 4  ;;  %s73_s28 = sshll.u32 %s3022_s6, 4  ;;  %s48_s25 = int_to_ptr.vmem [resolvable:$true] %s47_s25  ;;  %s74_s28 = int_to_ptr.hbm [resolvable:$true] %s73_s28 }
   0x7   :  { %s2252_s29 = smov 128   ;;  %s2253_s30 = smov 8  }
   0x8   :  { %53 = dma.hbm_to_vmem [thread:$0]  %s46_s23, 512, %s48_s25, [#allocation6], %s2252_s29, %s2252_s29, %s2253_s30  }
   0x9   :  { %s2254_s13 = smov [#allocation8]   ;;  %s32_s3 = sshll.u32 %s3018_s2, 4  ;;  %s33_s3 = int_to_ptr.hbm [resolvable:$true] %s32_s3 }
   0xa   :  { %s75_s14 = sshll.u32 %s2254_s13, 4  ;;  %s60_s18 = sshll.u32 %s3021_s5, 4  ;;  %s76_s14 = int_to_ptr.vmem [resolvable:$true] %s75_s14  ;;  %s61_s18 = int_to_ptr.hbm [resolvable:$true] %s60_s18 }
   0xb   :  { %81 = dma.hbm_to_vmem [thread:$0]  %s74_s28, 512, %s76_s14, [#allocation9], %s2252_s29, %s2252_s29, %s2253_s30  }
   0xc   :  { %s2255_s19 = smov [#allocation2]   ;;  %s2256_s21 = smov [#allocation7]  }
   0xd   :  { %s34_s20 = sshll.u32 %s2255_s19, 4  ;;  %s62_s2 = sshll.u32 %s2256_s21, 4  ;;  %s35_s20 = int_to_ptr.vmem [resolvable:$true] %s34_s20  ;;  %s63_s2 = int_to_ptr.vmem [resolvable:$true] %s62_s2 }
   0xe   :  { %40 = dma.hbm_to_vmem [thread:$0]  %s33_s3, 512, %s35_s20, [#allocation3], %s2252_s29, %s2252_s29, %s2253_s30  }
   0xf   :  { %s88_s24 = sshll.u32 %s3024_s8, 4  ;;  %s2257_s5 = smov [#allocation10]   ;;  %s89_s24 = int_to_ptr.hbm [resolvable:$true] %s88_s24 }
  0x10   :  { %68 = dma.hbm_to_vmem [thread:$0]  %s61_s18, 512, %s63_s2, [#allocation6], %s2252_s29, %s2252_s29, %s2253_s30  }
  0x11   :  { %s90_s25 = sshll.u32 %s2257_s5, 4  ;;  %s91_s25 = int_to_ptr.vmem [resolvable:$true] %s90_s25 }
  0x12   :  { %96 = dma.hbm_to_vmem [thread:$0]  %s89_s24, 1024, %s91_s25, [#allocation9], %s2252_s29, %s2252_s29, %s2253_s30  }
  0x13   :  { %2239 = dma.done.wait [#allocation3], 512  }
  0x14   :  { %2240 = vsyncadd [#allocation3], 4294966784 }
  0x15   :  { %2241 = dma.done.wait [#allocation6], 1024  }
  0x16   :  { %2242 = vsyncadd [#allocation6], 4294966272 }
  0x17   :  { %2243 = dma.done.wait [#allocation9], 1536  }
  0x18   :  { %2244 = vsyncadd [#allocation9], 4294965760  ;;  %v122_v0 = vld [vmem:[#allocation2 + $0x18] sm:$0xff]  ;;  %v121_v1 = vld [vmem:[#allocation2 + $0x10] sm:$0xff]  ;;  %vm127_vm0 = vcmask 261120   ;;  %v2258_v18 = vmov 0.0  }
  0x19   :  { %146 = vmatpush.msra.mxu1 %v122_v0  ;;  %1869 = vmatpush.msra.mxu2 %v122_v0  ;;  %v120_v2 = vld [vmem:[#allocation2 + $0x8] sm:$0xff]  ;;  %v2363_v3 = vld [vmem:[#allocation5 + $0x18] sm:$0xff]  ;;  %v119_v5 = vld [vmem:[#allocation2] sm:$0xff]  ;;  %v2259_v21 = vmov 0   ;;  %s2262_s18 = smov 96   ;;  %s2263_s13 = smov [#allocation11]  }
  0x1a   :  { %v2365_v4 = vld [vmem:[#allocation8 + $0x18] sm:$0xff]  ;;  %v2368_v6 = vld [vmem:[#allocation8 + $0x10] sm:$0xff]  ;;  %552 = vmatpush.msra.mxu0 %v2363_v3  ;;  %v117_v7 = vld [vmem:[%s3016_s0] sm:$0xff]  ;;  %1890 = vset.pattern.permute.xlu2 %v2259_v21  ;;  %s1756_s14 = sshll.u32 %s2263_s13, 4  ;;  %s2264_s15 = smov [#allocation15]   ;;  %s1757_s14 = int_to_ptr.vmem [resolvable:$true] %s1756_s14 }
  0x1b   :  { %147 = vmatpush.msra.mxu1 %v121_v1  ;;  %1870 = vmatpush.msra.mxu2 %v121_v1  ;;  %v118_v8 = vld [vmem:[%s3016_s0 + $0x8] sm:$0xff]  ;;  %v2377_v9 = vld [vmem:[#allocation5 + $0x10] sm:$0xff]  ;;  %v160_v10 = vld [vmem:[#allocation7 + $0x18] sm:$0xff]  ;;  %s1758_s0 = sshll.u32 %s3025_s9, 4  ;;  %s1795_s16 = sshll.u32 %s2264_s15, 4  ;;  %s1759_s0 = int_to_ptr.hbm [resolvable:$true] %s1758_s0  ;;  %s1796_s16 = int_to_ptr.vmem [resolvable:$true] %s1795_s16 }
  0x1c   :  { %274 = vmatpush.msra.mxu3 %v2365_v4  ;;  %553 = vmatpush.msra.mxu0 %v2377_v9  ;;  %v2381_v11 = vld [vmem:[#allocation8 + $0x8] sm:$0xff]  ;;  %v159_v12 = vld [vmem:[#allocation7 + $0x10] sm:$0xff]  ;;  %v2388_v14 = vld [vmem:[#allocation8] sm:$0xff]  ;;  %s1797_s6 = sshll.u32 %s3028_s12, 4  ;;  %s2265_s9 = smov 2   ;;  %s1798_s6 = int_to_ptr.hbm [resolvable:$true] %s1797_s6 }
  0x1d   :  { %148 = vmatpush.msra.mxu1 %v120_v2  ;;  %1871 = vmatpush.msra.mxu2 %v120_v2  ;;  %v2386_v13 = vld [vmem:[#allocation5 + $0x8] sm:$0xff]  ;;  %v2393_v16 = vld [vmem:[#allocation5] sm:$0xff]  ;;  %s2266_s17 = smov [#allocation12]   ;;  %s1771_s12 = sshll.u32 %s3026_s10, 4  ;;  %s1772_s12 = int_to_ptr.hbm [resolvable:$true] %s1771_s12 }
  0x1e   :  { %275 = vmatpush.msra.mxu3 %v2368_v6  ;;  %v158_v15 = vld [vmem:[#allocation7 + $0x8] sm:$0xff]  ;;  %554 = vmatpush.msra.mxu0 %v2386_v13  ;;  %v157_v17 = vld [vmem:[#allocation7] sm:$0xff]  ;;  %s2267_s21 = smov [#allocation14]   ;;  %s1784_s24 = sshll.u32 %s3027_s11, 4  ;;  %s1785_s24 = int_to_ptr.hbm [resolvable:$true] %s1784_s24 }
  0x1f   :  { %149 = vmatpush.msra.mxu1 %v119_v5  ;;  %1872 = vmatpush.msra.mxu2 %v119_v5  ;;  %v196_v20 = vld [vmem:[%s3017_s1] sm:$0x3]  ;;  %s1782_s2 = sshll.u32 %s2267_s21, 4  ;;  %s1783_s2 = int_to_ptr.vmem [resolvable:$true] %s1782_s2 }
  0x20   :  { %1826 = vmatmul.msk.f32.vlgmr.msra.gmra.mxu1 %vm127_vm0, %v117_v7  ;;  %1827 = vmatmul.msk.f32.vlgmr.msra.gmra.mxu2 %vm127_vm0, %v118_v8  ;;  %vm197_vm1 = vcmp.gt.f32.partialorder %v196_v20, 0.0  ;;  %v1893_v23 = vld [vmem:[%s3020_s4] ss:$0 sm:$0xff]  ;;  %s2260_s4 = smov 64  }
  0x21   :  { %216 = vmatpush.msrb.mxu2 %v2363_v3  ;;  %177 = vmatpush.msrb.mxu1 %v160_v10  ;;  %v323_v22 = vsel %vm197_vm1, 1, %v2259_v21  ;;  %v1894_v26 = vld [vmem:[%s3023_s7] ss:$0 sm:$0xff]  ;;  %s2261_s7 = smov 32  }
  0x22   :  { %276 = vmatpush.msra.mxu3 %v2381_v11  ;;  %555 = vmatpush.msra.mxu0 %v2393_v16 }
  0x23   :  { %217 = vmatpush.msrb.mxu2 %v2377_v9  ;;  %178 = vmatpush.msrb.mxu1 %v159_v12 }
  0x24   :  { %277 = vmatpush.msra.mxu3 %v2388_v14  ;;  %895 = vmatpush.msrb.mxu0 %v2363_v3 }
  0x25   :  { %218 = vmatpush.msrb.mxu2 %v2386_v13  ;;  %179 = vmatpush.msrb.mxu1 %v158_v15 }
  0x26   :  { %278 = vmatmul.f32.vlgmr.msra.gmra.mxu3 %v2258_v18  ;;  %896 = vmatpush.msrb.mxu0 %v2377_v9 }
  0x27   :  { %219 = vmatpush.msrb.mxu2 %v2393_v16  ;;  %180 = vmatpush.msrb.mxu1 %v157_v17 }
  0x28   :  { %1828 = vmatmul.msk.f32.vlgmr.msrb.gmra.mxu1 %vm127_vm0, %v117_v7  ;;  %220 = vmatmul.f32.vlgmr.msrb.gmra.mxu2 %v2258_v18 }
  0x29   :  { %370 = vmatpush.msra.mxu2 %v2363_v3  ;;  %437 = vmatpush.msrb.mxu3 %v2365_v4 }
  0x2a   :  { %621 = vmatpush.msra.mxu1 %v2365_v4  ;;  %897 = vmatpush.msrb.mxu0 %v2386_v13 }
  0x2b   :  { %371 = vmatpush.msra.mxu2 %v2377_v9  ;;  %438 = vmatpush.msrb.mxu3 %v2368_v6 }
  0x2c   :  { %622 = vmatpush.msra.mxu1 %v2368_v6  ;;  %898 = vmatpush.msrb.mxu0 %v2393_v16 }
  0x2d   :  { %372 = vmatpush.msra.mxu2 %v2386_v13  ;;  %439 = vmatpush.msrb.mxu3 %v2381_v11 }
  0x2e   :  { %623 = vmatpush.msra.mxu1 %v2381_v11  ;;  %1891 = vset.pattern.permute.xlu1 %v2259_v21 }
  0x2f   :  { %373 = vmatpush.msra.mxu2 %v2393_v16  ;;  %440 = vmatpush.msrb.mxu3 %v2388_v14 }
  0x30   :  { %1829 = vmatmul.msk.f32.gmra.mxu1 %vm127_vm0, %v118_v8  ;;  %1892 = vset.pattern.permute.xlu0 %v2259_v21  ;;  %v1830_v8 = vld [vmem:[%s3017_s1 + $0xe] sm:$0x3] }
  0x31   :  { %732 = vmatpush.msrb.mxu2 %v2363_v3  ;;  %624 = vmatpush.msra.mxu1 %v2388_v14  ;;  %vm200_vm10 = vcmp.gt.f32.partialorder %v1830_v8, 0.0 }
  0x32   :  { %801 = vmatpush.msra.mxu3 %v2365_v4  ;;  %325 = vperm.xlu2 %1890, %v323_v22   ;;  %v330_v10 = vsel %vm200_vm10, 1, %v2259_v21 }
  0x33   :  { %733 = vmatpush.msrb.mxu2 %v2377_v9  ;;  %962 = vmatpush.msrb.mxu1 %v2365_v4 }
  0x34   :  { %802 = vmatpush.msra.mxu3 %v2368_v6 }
  0x35   :  { %734 = vmatpush.msrb.mxu2 %v2386_v13  ;;  %963 = vmatpush.msrb.mxu1 %v2368_v6 }
  0x36   :  { %803 = vmatpush.msra.mxu3 %v2381_v11 }
  0x37   :  { %735 = vmatpush.msrb.mxu2 %v2393_v16  ;;  %964 = vmatpush.msrb.mxu1 %v2381_v11 }
  0x38   :  { %804 = vmatpush.msra.mxu3 %v2388_v14 }
  0x39   :  { %965 = vmatpush.msrb.mxu1 %v2388_v14 }
  0x8c   :  { %v2460_v12 = vpop.permute.xlu2 %325 }
  0x8d   :  { %vm327_vm11 = vcmp.eq.s32.totalorder %v2460_v12, 1 }
  0x9d   :  { %v151_v19 = vpop.f32.mrf.mxu1 }
  0x9e   :  { %v2446_v29 = vadd.f32 %v1893_v23, %v151_v19 }
  0xa3   :  { %v154_v24 = vpop.f32.mrf.mxu2 }
  0xa4   :  { %v2439_v25 = vadd.f32 %v1893_v23, %v154_v24 }
  0xa5   :  { %v182_v27 = vpop.f32.mrf.mxu1 }
  0xa6   :  { %v2444_v28 = vadd.f32 %v1894_v26, %v182_v27 }
  0xa9   :  { %v279_v30 = vpop.f32.mrf.mxu3 }
  0xaa   :  { %v283_v33 = vrot.slane %v279_v30, 2 }
  0xab   :  { %v221_v31 = vpop.f32.mrf.mxu2 }
  0xac   :  { %v224_v32 = vadd.f32 %v221_v31, %v2446_v29 }
  0xad   :  { %v185_v34 = vpop.f32.mrf.mxu1 }
  0xae   :  { %1895 = vtanh.f32 %v224_v32  ;;  %v2449_v35 = vadd.f32 %v1894_v26, %v185_v34  ;;  %v1831_v39 = vmul.f32 -1.442695, %v224_v32 }
  0xb0   :  { %v285_v36 = vadd.f32 %v283_v33, %v2449_v35 }
  0xb2   :  { %1897 = vtanh.f32 %v285_v36  ;;  %v1832_v40 = vmul.f32 -1.442695, %v285_v36 }
  0xb3   :  { %1899 = vpow2.f32 %v1831_v39 }
  0xb4   :  { %v1896_v37 = vpop.eup %1895  ;;  %1901 = vpow2.f32 %v1832_v40 }
  0xb5   :  { %247 = vrot.lane.b32.xlu0 %v1896_v37, %s2260_s4 }
  0xb8   :  { %v1898_v38 = vpop.eup %1897 }
  0xb9   :  { %308 = vrot.lane.b32.xlu1 %v1898_v38, %s2260_s4  ;;  %v1900_v41 = vpop.eup %1899 }
  0xba   :  { %v1902_v42 = vpop.eup %1901  ;;  %v228_v43 = vadd.f32 1.0, %v1900_v41 }
  0xbb   :  { %v289_v44 = vadd.f32 1.0, %v1902_v42 }
  0xbc   :  { %1903 = vrcp.f32 %v228_v43  ;;  %vm234_vm5 = vweird.f32 %v228_v43  ;;  %v240_v54 = vand.u32 2147483648, %v228_v43  ;;  %v238_v56 = vand.u32 2147483647, %v228_v43 }
  0xbd   :  { %1905 = vrcp.f32 %v289_v44  ;;  %vm295_vm3 = vweird.f32 %v289_v44  ;;  %v301_v55 = vand.u32 2147483648, %v289_v44  ;;  %v299_v58 = vand.u32 2147483647, %v289_v44 }
  0xbe   :  { %v241_v60 = vor.u32 1.1754944e-38, %v240_v54  ;;  %vm239_vm8 = vcmp.eq.f32.partialorder %v238_v56, 8.507059e+37 }
  0xbf   :  { %v302_v61 = vor.u32 1.1754944e-38, %v301_v55  ;;  %vm300_vm9 = vcmp.eq.f32.partialorder %v299_v58, 8.507059e+37 }
  0xc2   :  { %v1904_v45 = vpop.eup %1903 }
  0xc3   :  { %v1906_v46 = vpop.eup %1905  ;;  %v230_v47 = vmul.f32 %v1904_v45, %v228_v43  ;;  %vm235_vm2 = vweird.f32 %v1904_v45 }
  0xc4   :  { %v291_v48 = vmul.f32 %v1906_v46, %v289_v44  ;;  %vm296_vm4 = vweird.f32 %v1906_v46  ;;  %vm236_vm6 = vmor %vm234_vm5, %vm235_vm2 }
  0xc5   :  { %v231_v49 = vsub.f32 1.0, %v230_v47  ;;  %vm297_vm7 = vmor %vm295_vm3, %vm296_vm4 }
  0xc6   :  { %v292_v50 = vsub.f32 1.0, %v291_v48 }
  0xc7   :  { %v232_v51 = vmul.f32 %v1904_v45, %v231_v49 }
  0xc8   :  { %v293_v52 = vmul.f32 %v1906_v46, %v292_v50 }
  0xc9   :  { %v233_v53 = vadd.f32 %v1904_v45, %v232_v51 }
  0xca   :  { %v294_v57 = vadd.f32 %v1906_v46, %v293_v52 }
  0xcb   :  { %v237_v59 = vsel %vm236_vm6, %v1904_v45, %v233_v53 }
  0xcc   :  { %v298_v62 = vsel %vm297_vm7, %v1906_v46, %v294_v57  ;;  %v242_v0 = vsel %vm239_vm8, %v241_v60, %v237_v59 }
  0xcd   :  { %v303_v2 = vsel %vm300_vm9, %v302_v61, %v298_v62  ;;  %v245_v15 = vmul.f32 0.0, %v242_v0 }
  0xce   :  { %v306_v20 = vmul.f32 0.0, %v303_v2 }
 0x127   :  { %v248_v63 = vpop.permute.xlu0 %247 }
 0x128   :  { %v250_v1 = vmul.f32 %v248_v63, %v242_v0 }
 0x12a   :  { %252 = vrot.lane.b32.xlu0 %v250_v1, %s2261_s7 }
 0x12b   :  { %v309_v5 = vpop.permute.xlu1 %308 }
 0x12c   :  { %v311_v7 = vmul.f32 %v309_v5, %v303_v2 }
 0x12e   :  { %313 = vrot.lane.b32.xlu2 %v311_v7, %s2261_s7 }
 0x136   :  { %332 = vperm.xlu2 %1890, %v330_v10  }
 0x188   :  { %v314_v19 = vpop.permute.xlu2 %313 }
 0x189   :  { %v316_v22 = vadd.f32 %v314_v19, %v306_v20 }
 0x18b   :  { %v342_v34 = vrot.slane %v316_v22, 6 }
 0x190   :  { %v2482_v37 = vpop.permute.xlu2 %332 }
 0x191   :  { %vm334_vm12 = vcmp.eq.s32.totalorder %v2482_v37, 1 }
 0x19c   :  { %v253_v17 = vpop.permute.xlu0 %252 }
 0x19d   :  { %v2462_v18 = vadd.f32 %v253_v17, %v245_v15 }
 0x19f   :  { %1907 = vtanh.f32 %v2462_v18 }
 0x1a0   :  { %1909 = vtanh.f32 %v316_v22 }
 0x1a5   :  { %v1908_v23 = vpop.eup %1907 }
 0x1a6   :  { %258 = vrot.lane.b32.xlu1 %v1908_v23, %s2260_s4  ;;  %v1910_v24 = vpop.eup %1909 }
 0x1ae   :  { %319 = vrot.lane.b32.xlu1 %v1910_v24, %s2260_s4 }
 0x218   :  { %v259_v26 = vpop.permute.xlu1 %258 }
 0x219   :  { %v261_v27 = vmul.f32 %v259_v26, %v242_v0 }
 0x21b   :  { %v2470_v30 = vsel %vm327_vm11, %v261_v27, 0.0 }
 0x21c   :  { %354 = vrot.lane.b32.xlu0 %v2470_v30, %s2261_s7 }
 0x220   :  { %v320_v31 = vpop.permute.xlu1 %319 }
 0x221   :  { %v322_v32 = vmul.f32 %v320_v31, %v303_v2 }
 0x223   :  { %v336_v33 = vrot.slane %v322_v32, 6  ;;  %v329_v32 = vsel %vm327_vm11, %v2462_v18, 0.0 }
 0x225   :  { %337 = vrot.lane.b32.xlu0 %v336_v33, %s2261_s7  ;;  %v403_v33 = vrot.slane %v329_v32, 6 }
 0x22d   :  { %343 = vrot.lane.b32.xlu0 %v342_v34, %s2262_s18 }
 0x28e   :  { %v2476_v36 = vpop.permute.xlu0 %354 }
 0x28f   :  { %1835 = vmatmul.msk.f32.vlgmr.msra.gmra.mxu2 %vm127_vm0, %v2476_v36 }
 0x290   :  { %1054 = vmatpush.msra.mxu2 %v2363_v3 }
 0x292   :  { %1055 = vmatpush.msra.mxu2 %v2377_v9 }
 0x294   :  { %1056 = vmatpush.msra.mxu2 %v2386_v13 }
 0x296   :  { %1057 = vmatpush.msra.mxu2 %v2393_v16 }
 0x297   :  { %v338_v38 = vpop.permute.xlu0 %337 }
 0x298   :  { %v2489_v39 = vsel %vm334_vm12, %v338_v38, 0.0 }
 0x299   :  { %1837 = vmatmul.msk.f32.vlgmr.msrb.gmra.mxu3 %vm127_vm0, %v2489_v39 }
 0x29a   :  { %1121 = vmatpush.msrb.mxu3 %v2365_v4 }
 0x29c   :  { %1122 = vmatpush.msrb.mxu3 %v2368_v6 }
 0x29e   :  { %1123 = vmatpush.msrb.mxu3 %v2381_v11 }
 0x29f   :  { %v344_v40 = vpop.permute.xlu0 %343 }
 0x2a0   :  { %v2498_v41 = vsel %vm334_vm12, %v344_v40, 0.0  ;;  %1124 = vmatpush.msrb.mxu3 %v2388_v14 }
 0x2a1   :  { %v470_v42 = vrot.slane %v2498_v41, 4 }
 0x2a3   :  { %471 = vrot.lane.b32.xlu0 %v470_v42, %s2261_s7 }
 0x312   :  { %v375_v43 = vpop.f32.mrf.mxu2 }
 0x313   :  { %v379_v44 = vrot.slane %v375_v43, 6  ;;  %v1833_v43 = vld [vmem:[%s3017_s1 + $0x2] sm:$0x3] }
 0x314   :  { %vm349_vm6 = vcmp.gt.f32.partialorder %v1833_v43, 0.0 }
 0x315   :  { %v381_v45 = vadd.f32 %v379_v44, %v2446_v29  ;;  %v491_v44 = vsel %vm349_vm6, 1, %v2259_v21 }
 0x317   :  { %1911 = vtanh.f32 %v381_v45  ;;  %v1836_v51 = vmul.f32 -1.442695, %v381_v45  ;;  %v1834_v45 = vld [vmem:[%s3017_s1 + $0xc] sm:$0x3] }
 0x318   :  { %vm352_vm7 = vcmp.gt.f32.partialorder %v1834_v45, 0.0 }
 0x319   :  { %v512_v18 = vsel %vm352_vm7, 1, %v2259_v21 }
 0x31c   :  { %v442_v46 = vpop.f32.mrf.mxu3 }
 0x31d   :  { %v1912_v47 = vpop.eup %1911  ;;  %v446_v48 = vrot.slane %v442_v46, 4  ;;  %v472_v46 = vpop.permute.xlu0 %471 }
 0x31e   :  { %407 = vrot.lane.b32.xlu1 %v1912_v47, %s2260_s4 }
 0x31f   :  { %v448_v49 = vadd.f32 %v446_v48, %v2449_v35 }
 0x321   :  { %1913 = vtanh.f32 %v448_v49  ;;  %v1838_v53 = vmul.f32 -1.442695, %v448_v49 }
 0x322   :  { %1915 = vpow2.f32 %v1836_v51 }
 0x323   :  { %1917 = vpow2.f32 %v1838_v53 }
 0x327   :  { %v1914_v50 = vpop.eup %1913 }
 0x328   :  { %476 = vrot.lane.b32.xlu1 %v1914_v50, %s2260_s4  ;;  %v1916_v52 = vpop.eup %1915 }
 0x329   :  { %v385_v54 = vadd.f32 1.0, %v1916_v52  ;;  %v1918_v55 = vpop.eup %1917 }
 0x32a   :  { %v452_v57 = vadd.f32 1.0, %v1918_v55 }
 0x32b   :  { %1919 = vrcp.f32 %v385_v54  ;;  %v397_v0 = vand.u32 2147483648, %v385_v54  ;;  %vm391_vm14 = vweird.f32 %v385_v54  ;;  %v395_v1 = vand.u32 2147483647, %v385_v54 }
 0x32c   :  { %1921 = vrcp.f32 %v452_v57  ;;  %v464_v20 = vand.u32 2147483648, %v452_v57  ;;  %vm458_vm3 = vweird.f32 %v452_v57  ;;  %v462_v22 = vand.u32 2147483647, %v452_v57 }
 0x32d   :  { %v398_v7 = vor.u32 1.1754944e-38, %v397_v0  ;;  %vm396_vm1 = vcmp.eq.f32.partialorder %v395_v1, 8.507059e+37 }
 0x32e   :  { %v465_v24 = vor.u32 1.1754944e-38, %v464_v20  ;;  %vm463_vm5 = vcmp.eq.f32.partialorder %v462_v22, 8.507059e+37 }
 0x331   :  { %v1920_v56 = vpop.eup %1919 }
 0x332   :  { %v387_v58 = vmul.f32 %v1920_v56, %v385_v54  ;;  %v1922_v60 = vpop.eup %1921  ;;  %vm392_vm13 = vweird.f32 %v1920_v56 }
 0x333   :  { %v454_v62 = vmul.f32 %v1922_v60, %v452_v57  ;;  %vm393_vm15 = vmor %vm391_vm14, %vm392_vm13  ;;  %vm459_vm2 = vweird.f32 %v1922_v60 }
 0x334   :  { %v388_v59 = vsub.f32 1.0, %v387_v58  ;;  %vm460_vm4 = vmor %vm458_vm3, %vm459_vm2 }
 0x335   :  { %v455_v2 = vsub.f32 1.0, %v454_v62 }
 0x336   :  { %v389_v61 = vmul.f32 %v1920_v56, %v388_v59 }
 0x337   :  { %v456_v8 = vmul.f32 %v1922_v60, %v455_v2 }
 0x338   :  { %v390_v63 = vadd.f32 %v1920_v56, %v389_v61 }
 0x339   :  { %v457_v19 = vadd.f32 %v1922_v60, %v456_v8 }
 0x33a   :  { %v394_v5 = vsel %vm393_vm15, %v1920_v56, %v390_v63 }
 0x33b   :  { %v399_v10 = vsel %vm396_vm1, %v398_v7, %v394_v5  ;;  %v461_v23 = vsel %vm460_vm4, %v1922_v60, %v457_v19 }
 0x33c   :  { %v466_v26 = vsel %vm463_vm5, %v465_v24, %v461_v23  ;;  %v405_v34 = vmul.f32 %v403_v33, %v399_v10 }
 0x33d   :  { %v474_v47 = vmul.f32 %v472_v46, %v466_v26 }
 0x390   :  { %v408_v15 = vpop.permute.xlu1 %407 }
 0x391   :  { %v410_v17 = vmul.f32 %v408_v15, %v399_v10 }
 0x393   :  { %412 = vrot.lane.b32.xlu2 %v410_v17, %s2261_s7 }
 0x39a   :  { %v477_v27 = vpop.permute.xlu1 %476 }
 0x39b   :  { %v479_v31 = vmul.f32 %v477_v27, %v466_v26 }
 0x39d   :  { %481 = vrot.lane.b32.xlu1 %v479_v31, %s2261_s7 }
 0x3ed   :  { %v413_v38 = vpop.permute.xlu2 %412 }
 0x3ee   :  { %v415_v40 = vadd.f32 %v413_v38, %v405_v34 }
 0x3f0   :  { %1923 = vtanh.f32 %v415_v40  ;;  %v504_v51 = vrot.slane %v415_v40, 2 }
 0x3f6   :  { %v1924_v42 = vpop.eup %1923 }
 0x3f7   :  { %418 = vrot.lane.b32.xlu2 %v1924_v42, %s2260_s4 }
 0x3ff   :  { %493 = vperm.xlu2 %1890, %v491_v44  }
 0x407   :  { %514 = vperm.xlu2 %1890, %v512_v18  }
 0x40f   :  { %508 = vrot.lane.b32.xlu2 %v329_v32, %s2262_s18  ;;  %v482_v48 = vpop.permute.xlu1 %481 }
 0x410   :  { %v484_v49 = vadd.f32 %v482_v48, %v474_v47 }
 0x412   :  { %1925 = vtanh.f32 %v484_v49  ;;  %v524_v15 = vrot.slane %v484_v49, 4 }
 0x418   :  { %v1926_v50 = vpop.eup %1925 }
 0x419   :  { %487 = vrot.lane.b32.xlu1 %v1926_v50, %s2260_s4 }
 0x421   :  { %505 = vrot.lane.b32.xlu1 %v504_v51, %s2262_s18 }
 0x451   :  { %v419_v52 = vpop.permute.xlu2 %418 }
 0x452   :  { %v421_v53 = vmul.f32 %v419_v52, %v399_v10 }
 0x454   :  { %v497_v54 = vrot.slane %v421_v53, 2 }
 0x456   :  { %498 = vrot.lane.b32.xlu0 %v497_v54, %s2261_s7 }
 0x459   :  { %v2525_v55 = vpop.permute.xlu2 %493 }
 0x45a   :  { %vm495_vm8 = vcmp.eq.s32.totalorder %v2525_v55, 1 }
 0x461   :  { %v2527_v56 = vpop.permute.xlu2 %514 }
 0x462   :  { %vm516_vm9 = vcmp.eq.s32.totalorder %v2527_v56, 1  ;;  %v1690_v56 = vrot.slane %v2489_v39, 2 }
 0x469   :  { %v509_v60 = vpop.permute.xlu2 %508 }
 0x48b   :  { %v488_v57 = vpop.permute.xlu1 %487 }
 0x48c   :  { %v490_v58 = vmul.f32 %v488_v57, %v466_v26 }
 0x48e   :  { %v518_v59 = vrot.slane %v490_v58, 4 }
 0x490   :  { %519 = vrot.lane.b32.xlu0 %v518_v59, %s2261_s7 }
 0x493   :  { %v506_v61 = vpop.permute.xlu1 %505 }
 0x494   :  { %v2533_v62 = vsel %vm495_vm8, %v506_v61, %v509_v60 }
 0x495   :  { %v585_v63 = vrot.slane %v2533_v62, 4 }
 0x497   :  { %586 = vrot.lane.b32.xlu1 %v585_v63, %s2261_s7 }
 0x4c8   :  { %v2537_v0 = vpop.permute.xlu0 %498 }
 0x4c9   :  { %v2543_v1 = vsel %vm495_vm8, %v2537_v0, %v2476_v36 }
 0x4ca   :  { %1841 = vmatmul.msk.f32.vlgmr.msra.gmra.mxu0 %vm127_vm0, %v2543_v1 }
 0x4cb   :  { %1220 = vmatpush.msra.mxu0 %v2363_v3 }
 0x4cd   :  { %1221 = vmatpush.msra.mxu0 %v2377_v9 }
 0x4cf   :  { %1222 = vmatpush.msra.mxu0 %v2386_v13 }
 0x4d1   :  { %1223 = vmatpush.msra.mxu0 %v2393_v16 }
 0x502   :  { %v2552_v2 = vpop.permute.xlu0 %519 }
 0x503   :  { %v2558_v36 = vsel %vm516_vm9, %v2552_v2, %v2489_v39 }
 0x504   :  { %1843 = vmatmul.msk.f32.vlgmr.msra.gmra.mxu1 %vm127_vm0, %v2558_v36 }
 0x505   :  { %1289 = vmatpush.msra.mxu1 %v2365_v4 }
 0x507   :  { %1290 = vmatpush.msra.mxu1 %v2368_v6 }
 0x509   :  { %1291 = vmatpush.msra.mxu1 %v2381_v11  ;;  %v587_v58 = vpop.permute.xlu1 %586 }
 0x50b   :  { %1292 = vmatpush.msra.mxu1 %v2388_v14 }
 0x547   :  { %v557_v5 = vpop.f32.mrf.mxu0 }
 0x548   :  { %v561_v7 = vrot.slane %v557_v5, 4 }
 0x54a   :  { %v563_v8 = vadd.f32 %v561_v7, %v2446_v29 }
 0x54c   :  { %1927 = vtanh.f32 %v563_v8  ;;  %v1842_v23 = vmul.f32 -1.442695, %v563_v8 }
 0x552   :  { %v1928_v10 = vpop.eup %1927 }
 0x553   :  { %591 = vrot.lane.b32.xlu0 %v1928_v10, %s2260_s4 }
 0x55b   :  { %525 = vrot.lane.b32.xlu0 %v524_v15, %s2262_s18 }
 0x581   :  { %v626_v17 = vpop.f32.mrf.mxu1 }
 0x582   :  { %v630_v19 = vrot.slane %v626_v17, 6 }
 0x584   :  { %v632_v20 = vadd.f32 %v630_v19, %v2449_v35 }
 0x586   :  { %1929 = vtanh.f32 %v632_v20  ;;  %v1844_v49 = vmul.f32 -1.442695, %v632_v20  ;;  %v1839_v20 = vld [vmem:[%s3017_s1 + $0x4] sm:$0x3] }
 0x587   :  { %1931 = vpow2.f32 %v1842_v23  ;;  %vm533_vm5 = vcmp.gt.f32.partialorder %v1839_v20, 0.0  ;;  %v1840_v23 = vld [vmem:[%s3017_s1 + $0xa] sm:$0x3] }
 0x588   :  { %vm536_vm6 = vcmp.gt.f32.partialorder %v1840_v23, 0.0 }
 0x58c   :  { %v1930_v22 = vpop.eup %1929 }
 0x58d   :  { %660 = vrot.lane.b32.xlu1 %v1930_v22, %s2260_s4  ;;  %v1932_v24 = vpop.eup %1931  ;;  %v675_v22 = vsel %vm533_vm5, 1, %v2259_v21 }
 0x58e   :  { %v567_v26 = vadd.f32 1.0, %v1932_v24  ;;  %v692_v24 = vsel %vm536_vm6, 1, %v2259_v21 }
 0x590   :  { %1933 = vrcp.f32 %v567_v26  ;;  %v579_v38 = vand.u32 2147483648, %v567_v26  ;;  %vm573_vm13 = vweird.f32 %v567_v26  ;;  %v577_v40 = vand.u32 2147483647, %v567_v26 }
 0x591   :  { %1935 = vpow2.f32 %v1844_v49 }
 0x592   :  { %v580_v43 = vor.u32 1.1754944e-38, %v579_v38  ;;  %vm578_vm15 = vcmp.eq.f32.partialorder %v577_v40, 8.507059e+37 }
 0x596   :  { %v1934_v27 = vpop.eup %1933 }
 0x597   :  { %v569_v31 = vmul.f32 %v1934_v27, %v567_v26  ;;  %vm574_vm10 = vweird.f32 %v1934_v27  ;;  %v1936_v50 = vpop.eup %1935 }
 0x598   :  { %vm575_vm14 = vmor %vm573_vm13, %vm574_vm10  ;;  %v636_v51 = vadd.f32 1.0, %v1936_v50 }
 0x599   :  { %v570_v32 = vsub.f32 1.0, %v569_v31 }
 0x59a   :  { %1937 = vrcp.f32 %v636_v51  ;;  %v648_v60 = vand.u32 2147483648, %v636_v51  ;;  %vm642_vm2 = vweird.f32 %v636_v51 }
 0x59b   :  { %v571_v33 = vmul.f32 %v1934_v27, %v570_v32 }
 0x59c   :  { %v649_v63 = vor.u32 1.1754944e-38, %v648_v60 }
 0x59d   :  { %v572_v34 = vadd.f32 %v1934_v27, %v571_v33 }
 0x59f   :  { %v576_v42 = vsel %vm575_vm14, %v1934_v27, %v572_v34 }
 0x5a0   :  { %v581_v44 = vsel %vm578_vm15, %v580_v43, %v576_v42  ;;  %v1938_v52 = vpop.eup %1937 }
 0x5a1   :  { %v638_v53 = vmul.f32 %v1938_v52, %v636_v51  ;;  %vm643_vm1 = vweird.f32 %v1938_v52  ;;  %v589_v10 = vmul.f32 %v587_v58, %v581_v44 }
 0x5a2   :  { %vm644_vm3 = vmor %vm642_vm2, %vm643_vm1 }
 0x5a3   :  { %v639_v54 = vsub.f32 1.0, %v638_v53 }
 0x5a5   :  { %v640_v57 = vmul.f32 %v1938_v52, %v639_v54 }
 0x5a7   :  { %v641_v59 = vadd.f32 %v1938_v52, %v640_v57 }
 0x5a9   :  { %v645_v61 = vsel %vm644_vm3, %v1938_v52, %v641_v59 }
 0x5c5   :  { %v592_v45 = vpop.permute.xlu0 %591 }
 0x5c6   :  { %v594_v18 = vmul.f32 %v592_v45, %v581_v44 }
 0x5c8   :  { %596 = vrot.lane.b32.xlu2 %v594_v18, %s2261_s7 }
 0x5cd   :  { %v526_v46 = vpop.permute.xlu0 %525 }
 0x5ce   :  { %v2575_v47 = vsel %vm516_vm9, %v526_v46, %v2498_v41  ;;  %v646_v41 = vand.u32 2147483647, %v636_v51 }
 0x5cf   :  { %v654_v48 = vrot.slane %v2575_v47, 6 }
 0x5d0   :  { %vm647_vm4 = vcmp.eq.f32.partialorder %v646_v41, 8.507059e+37 }
 0x5d1   :  { %655 = vrot.lane.b32.xlu0 %v654_v48, %s2261_s7  ;;  %v650_v5 = vsel %vm647_vm4, %v649_v63, %v645_v61 }
 0x5ff   :  { %v661_v7 = vpop.permute.xlu1 %660 }
 0x600   :  { %v663_v8 = vmul.f32 %v661_v7, %v650_v5 }
 0x602   :  { %665 = vrot.lane.b32.xlu1 %v663_v8, %s2261_s7 }
 0x622   :  { %v597_v15 = vpop.permute.xlu2 %596 }
 0x623   :  { %v599_v17 = vadd.f32 %v597_v15, %v589_v10 }
 0x625   :  { %1939 = vtanh.f32 %v599_v17  ;;  %v687_v34 = vrot.slane %v599_v17, 4 }
 0x62b   :  { %v1940_v19 = vpop.eup %1939 }
 0x62c   :  { %602 = vrot.lane.b32.xlu2 %v1940_v19, %s2260_s4 }
 0x634   :  { %677 = vperm.xlu2 %1890, %v675_v22  }
 0x63c   :  { %694 = vperm.xlu2 %1890, %v692_v24  }
 0x643   :  { %v656_v26 = vpop.permute.xlu0 %655 }
 0x644   :  { %v658_v27 = vmul.f32 %v656_v26, %v650_v5 }
 0x674   :  { %v666_v31 = vpop.permute.xlu1 %665 }
 0x675   :  { %v668_v32 = vadd.f32 %v666_v31, %v658_v27 }
 0x677   :  { %1941 = vtanh.f32 %v668_v32 }
 0x67d   :  { %v1942_v33 = vpop.eup %1941 }
 0x67e   :  { %671 = vrot.lane.b32.xlu1 %v1942_v33, %s2260_s4 }
 0x686   :  { %v603_v38 = vpop.permute.xlu2 %602  ;;  %688 = vrot.lane.b32.xlu1 %v687_v34, %s2262_s18 }
 0x687   :  { %v605_v40 = vmul.f32 %v603_v38, %v581_v44 }
 0x689   :  { %v681_v42 = vrot.slane %v605_v40, 4 }
 0x68b   :  { %682 = vrot.lane.b32.xlu0 %v681_v42, %s2261_s7 }
 0x68e   :  { %v2592_v46 = vpop.permute.xlu2 %677 }
 0x68f   :  { %vm679_vm7 = vcmp.eq.s32.totalorder %v2592_v46, 1 }
 0x6f0   :  { %v672_v43 = vpop.permute.xlu1 %671 }
 0x6f1   :  { %v674_v45 = vmul.f32 %v672_v43, %v650_v5 }
 0x6f3   :  { %v698_v18 = vrot.slane %v674_v45, 2  ;;  %v1845_v45 = vld [vmem:[%s3017_s1 + $0x6] sm:$0x3] }
 0x6f4   :  { %vm713_vm6 = vcmp.gt.f32.partialorder %v1845_v45, 0.0 }
 0x6f5   :  { %699 = vrot.lane.b32.xlu0 %v698_v18, %s2261_s7 }
 0x6f8   :  { %v689_v48 = vpop.permute.xlu1 %688 }
 0x6f9   :  { %v2599_v49 = vsel %vm679_vm7, %v689_v48, %v2533_v62  ;;  %v2617_v62 = vpop.permute.xlu2 %694 }
 0x6fa   :  { %v765_v44 = vrot.slane %v2599_v49, 2  ;;  %vm696_vm10 = vcmp.eq.s32.totalorder %v2617_v62, 1 }
 0x6fd   :  { %v2602_v50 = vpop.permute.xlu0 %682  ;;  %766 = vrot.lane.b32.xlu0 %v765_v44, %s2261_s7 }
 0x6fe   :  { %v2609_v51 = vsel %vm679_vm7, %v2602_v50, %v2543_v1 }
 0x6ff   :  { %1847 = vmatmul.msk.f32.vlgmr.msrb.gmra.mxu2 %vm127_vm0, %v2609_v51 }
 0x700   :  { %1384 = vmatpush.msrb.mxu2 %v2363_v3 }
 0x702   :  { %1385 = vmatpush.msrb.mxu2 %v2377_v9 }
 0x704   :  { %1386 = vmatpush.msrb.mxu2 %v2386_v13 }
 0x706   :  { %1387 = vmatpush.msrb.mxu2 %v2393_v16 }
 0x767   :  { %v2620_v52 = vpop.permute.xlu0 %699 }
 0x768   :  { %v2626_v1 = vsel %vm696_vm10, %v2620_v52, %v2558_v36  ;;  %v704_v36 = vrot.slane %v668_v32, 2 }
 0x769   :  { %1849 = vmatmul.msk.f32.vlgmr.msra.gmra.mxu3 %vm127_vm0, %v2626_v1 }
 0x76a   :  { %1453 = vmatpush.msra.mxu3 %v2365_v4 }
 0x76c   :  { %1454 = vmatpush.msra.mxu3 %v2368_v6 }
 0x76e   :  { %1455 = vmatpush.msra.mxu3 %v2381_v11 }
 0x770   :  { %1456 = vmatpush.msra.mxu3 %v2388_v14 }
 0x782   :  { %v737_v3 = vpop.f32.mrf.mxu2 }
 0x783   :  { %v741_v9 = vrot.slane %v737_v3, 2  ;;  %v851_v3 = vsel %vm713_vm6, 1, %v2259_v21 }
 0x785   :  { %v743_v13 = vadd.f32 %v741_v9, %v2446_v29  ;;  %v1846_v9 = vld [vmem:[%s3017_s1 + $0x8] sm:$0x3] }
 0x787   :  { %1943 = vtanh.f32 %v743_v13  ;;  %v1848_v53 = vmul.f32 -1.442695, %v743_v13 }
 0x789   :  { %1945 = vpow2.f32 %v1848_v53 }
 0x78d   :  { %v1944_v16 = vpop.eup %1943 }
 0x78e   :  { %771 = vrot.lane.b32.xlu2 %v1944_v16, %s2260_s4 }
 0x78f   :  { %v1946_v4 = vpop.eup %1945 }
 0x790   :  { %v747_v54 = vadd.f32 1.0, %v1946_v4 }
 0x792   :  { %1947 = vrcp.f32 %v747_v54  ;;  %v759_v59 = vand.u32 2147483648, %v747_v54  ;;  %vm753_vm14 = vweird.f32 %v747_v54  ;;  %v757_v29 = vand.u32 2147483647, %v747_v54 }
 0x794   :  { %v760_v41 = vor.u32 1.1754944e-38, %v759_v59  ;;  %vm758_vm1 = vcmp.eq.f32.partialorder %v757_v29, 8.507059e+37 }
 0x796   :  { %705 = vrot.lane.b32.xlu2 %v704_v36, %s2262_s18 }
 0x798   :  { %v1948_v6 = vpop.eup %1947 }
 0x799   :  { %v749_v11 = vmul.f32 %v1948_v6, %v747_v54  ;;  %vm754_vm13 = vweird.f32 %v1948_v6 }
 0x79a   :  { %vm755_vm15 = vmor %vm753_vm14, %vm754_vm13  ;;  %vm716_vm13 = vcmp.gt.f32.partialorder %v1846_v9, 0.0 }
 0x79b   :  { %v750_v57 = vsub.f32 1.0, %v749_v11  ;;  %v868_v13 = vsel %vm716_vm13, 1, %v2259_v21 }
 0x79d   :  { %v751_v14 = vmul.f32 %v1948_v6, %v750_v57 }
 0x79f   :  { %v752_v58 = vadd.f32 %v1948_v6, %v751_v14 }
 0x7a1   :  { %v756_v60 = vsel %vm755_vm15, %v1948_v6, %v752_v58 }
 0x7a2   :  { %v761_v61 = vsel %vm758_vm1, %v760_v41, %v756_v60 }
 0x7e8   :  { %v772_v63 = vpop.permute.xlu2 %771 }
 0x7e9   :  { %v774_v5 = vmul.f32 %v772_v63, %v761_v61 }
 0x7eb   :  { %776 = vrot.lane.b32.xlu1 %v774_v5, %s2261_s7 }
 0x7ec   :  { %v806_v7 = vpop.f32.mrf.mxu3 }
 0x7ed   :  { %v809_v8 = vadd.f32 %v806_v7, %v2449_v35  ;;  %v767_v35 = vpop.permute.xlu0 %766 }
 0x7ee   :  { %v769_v27 = vmul.f32 %v767_v35, %v761_v61 }
 0x7ef   :  { %1949 = vtanh.f32 %v809_v8  ;;  %v1850_v19 = vmul.f32 -1.442695, %v809_v8 }
 0x7f0   :  { %v706_v10 = vpop.permute.xlu2 %705 }
 0x7f1   :  { %v708_v15 = vsel %vm696_vm10, %v706_v10, %v2575_v47  ;;  %1951 = vpow2.f32 %v1850_v19 }
 0x7f2   :  { %831 = vrot.lane.b32.xlu2 %v708_v15, %s2261_s7 }
 0x7f5   :  { %v1950_v17 = vpop.eup %1949 }
 0x7f6   :  { %836 = vrot.lane.b32.xlu0 %v1950_v17, %s2260_s4 }
 0x7f7   :  { %v1952_v20 = vpop.eup %1951 }
 0x7f8   :  { %v813_v22 = vadd.f32 1.0, %v1952_v20 }
 0x7fa   :  { %1953 = vrcp.f32 %v813_v22  ;;  %v825_v34 = vand.u32 2147483648, %v813_v22  ;;  %vm819_vm3 = vweird.f32 %v813_v22  ;;  %v823_v38 = vand.u32 2147483647, %v813_v22 }
 0x7fc   :  { %v826_v43 = vor.u32 1.1754944e-38, %v825_v34  ;;  %vm824_vm5 = vcmp.eq.f32.partialorder %v823_v38, 8.507059e+37 }
 0x800   :  { %v1954_v23 = vpop.eup %1953 }
 0x801   :  { %v815_v24 = vmul.f32 %v1954_v23, %v813_v22  ;;  %vm820_vm2 = vweird.f32 %v1954_v23 }
 0x802   :  { %vm821_vm4 = vmor %vm819_vm3, %vm820_vm2 }
 0x803   :  { %v816_v26 = vsub.f32 1.0, %v815_v24 }
 0x805   :  { %v817_v31 = vmul.f32 %v1954_v23, %v816_v26 }
 0x807   :  { %v818_v47 = vadd.f32 %v1954_v23, %v817_v31 }
 0x809   :  { %v822_v40 = vsel %vm821_vm4, %v1954_v23, %v818_v47 }
 0x80a   :  { %v827_v18 = vsel %vm824_vm5, %v826_v43, %v822_v40 }
 0x84c   :  { %v2655_v36 = vpop.permute.xlu2 %831 }
 0x84d   :  { %v834_v54 = vmul.f32 %v2655_v36, %v827_v18 }
 0x85d   :  { %v777_v32 = vpop.permute.xlu1 %776 }
 0x85e   :  { %v779_v33 = vadd.f32 %v777_v32, %v769_v27 }
 0x860   :  { %1955 = vtanh.f32 %v779_v33  ;;  %v863_v16 = vrot.slane %v779_v33, 6 }
 0x866   :  { %v1956_v42 = vpop.eup %1955 }
 0x867   :  { %782 = vrot.lane.b32.xlu1 %v1956_v42, %s2260_s4 }
 0x868   :  { %v837_v48 = vpop.permute.xlu0 %836 }
 0x869   :  { %v839_v44 = vmul.f32 %v837_v48, %v827_v18 }
 0x86b   :  { %841 = vrot.lane.b32.xlu0 %v839_v44, %s2261_s7 }
 0x86f   :  { %853 = vperm.xlu1 %1891, %v851_v3  }
 0x877   :  { %870 = vperm.xlu1 %1891, %v868_v13  }
 0x87f   :  { %864 = vrot.lane.b32.xlu1 %v863_v16, %s2262_s18 }
 0x8d9   :  { %v783_v53 = vpop.permute.xlu1 %782 }
 0x8da   :  { %v785_v4 = vmul.f32 %v783_v53, %v761_v61 }
 0x8dc   :  { %v857_v6 = vrot.slane %v785_v4, 6 }
 0x8dd   :  { %v842_v11 = vpop.permute.xlu0 %841 }
 0x8de   :  { %v2658_v57 = vadd.f32 %v842_v11, %v834_v54  ;;  %858 = vrot.lane.b32.xlu2 %v857_v6, %s2261_s7 }
 0x8e0   :  { %1957 = vtanh.f32 %v2658_v57 }
 0x8e1   :  { %v2665_v21 = vpop.permute.xlu1 %853 }
 0x8e2   :  { %vm855_vm14 = vcmp.eq.s32.totalorder %v2665_v21, 1 }
 0x8e6   :  { %v1958_v14 = vpop.eup %1957  ;;  %873 = vrot.lane.b32.xlu2 %v2626_v1, %s2262_s18 }
 0x8e7   :  { %847 = vrot.lane.b32.xlu0 %v1958_v14, %s2260_s4 }
 0x8e9   :  { %v2675_v29 = vpop.permute.xlu1 %870 }
 0x8ea   :  { %vm872_vm15 = vcmp.eq.s32.totalorder %v2675_v29, 1 }
 0x8f1   :  { %v865_v63 = vpop.permute.xlu1 %864 }
 0x938   :  { %v2668_v58 = vpop.permute.xlu2 %858 }
 0x939   :  { %v861_v59 = vsel %vm855_vm14, %v2668_v58, %v2609_v51  ;;  %v867_v51 = vsel %vm855_vm14, %v865_v63, %v2599_v49 }
 0x93a   :  { %1851 = vmatmul.msk.f32.vlgmr.msrb.gmra.mxu0 %vm127_vm0, %v861_v59 }
 0x940   :  { %v874_v1 = vpop.permute.xlu2 %873 }
 0x959   :  { %v848_v60 = vpop.permute.xlu0 %847 }
 0x95a   :  { %v2677_v41 = vmul.f32 %v848_v60, %v827_v18 }
 0x95c   :  { %v876_v61 = vsel %vm872_vm15, %v2677_v41, %v874_v1 }
 0x95d   :  { %946 = vrot.lane.b32.xlu0 %v876_v61, %s2261_s7 }
 0x965   :  { %925 = vrot.lane.b32.xlu0 %v867_v51, %s2261_s7  ;;  %v877_v51 = vsel %vm872_vm15, %v2658_v57, %v2655_v36 }
 0x9b7   :  { %v900_v5 = vpop.f32.mrf.mxu0 }
 0x9b8   :  { %v903_v7 = vadd.f32 %v900_v5, %v2439_v25 }
 0x9ba   :  { %1959 = vtanh.f32 %v903_v7  ;;  %v1852_v15 = vmul.f32 -1.442695, %v903_v7 }
 0x9bc   :  { %1961 = vpow2.f32 %v1852_v15 }
 0x9c0   :  { %v1960_v8 = vpop.eup %1959 }
 0x9c1   :  { %930 = vrot.lane.b32.xlu2 %v1960_v8, %s2260_s4  ;;  %v995_v8 = vrot.slane %v877_v51, 2 }
 0x9c2   :  { %v1962_v17 = vpop.eup %1961 }
 0x9c3   :  { %v907_v19 = vadd.f32 1.0, %v1962_v17 }
 0x9c5   :  { %1963 = vrcp.f32 %v907_v19  ;;  %v919_v26 = vand.u32 2147483648, %v907_v19  ;;  %vm913_vm2 = vweird.f32 %v907_v19  ;;  %v917_v35 = vand.u32 2147483647, %v907_v19 }
 0x9c7   :  { %v920_v31 = vor.u32 1.1754944e-38, %v919_v26  ;;  %vm918_vm4 = vcmp.eq.f32.partialorder %v917_v35, 8.507059e+37 }
 0x9cb   :  { %v1964_v49 = vpop.eup %1963 }
 0x9cc   :  { %v909_v20 = vmul.f32 %v1964_v49, %v907_v19  ;;  %vm914_vm1 = vweird.f32 %v1964_v49 }
 0x9cd   :  { %vm915_vm3 = vmor %vm913_vm2, %vm914_vm1 }
 0x9ce   :  { %v910_v22 = vsub.f32 1.0, %v909_v20 }
 0x9cf   :  { %v2690_v10 = vpop.permute.xlu0 %946 }
 0x9d0   :  { %1853 = vmatmul.msk.f32.vlgmr.msrb.gmra.mxu1 %vm127_vm0, %v2690_v10  ;;  %v911_v23 = vmul.f32 %v1964_v49, %v910_v22 }
 0x9d2   :  { %v912_v24 = vadd.f32 %v1964_v49, %v911_v23 }
 0x9d4   :  { %v916_v27 = vsel %vm915_vm3, %v1964_v49, %v912_v24 }
 0x9d5   :  { %v921_v32 = vsel %vm918_vm4, %v920_v31, %v916_v27 }
 0x9d7   :  { %v2698_v45 = vpop.permute.xlu0 %925 }
 0x9d8   :  { %v928_v18 = vmul.f32 %v2698_v45, %v921_v32 }
 0xa1b   :  { %v931_v33 = vpop.permute.xlu2 %930 }
 0xa1c   :  { %v933_v47 = vmul.f32 %v931_v33, %v921_v32 }
 0xa1e   :  { %935 = vrot.lane.b32.xlu1 %v933_v47, %s2261_s7 }
 0xa26   :  { %1014 = vrot.lane.b32.xlu1 %v861_v59, %s2262_s18 }
 0xa4d   :  { %v967_v34 = vpop.f32.mrf.mxu1 }
 0xa4e   :  { %v971_v38 = vrot.slane %v967_v34, 2 }
 0xa50   :  { %v973_v40 = vadd.f32 %v971_v38, %v2444_v28 }
 0xa52   :  { %1965 = vtanh.f32 %v973_v40  ;;  %v1854_v43 = vmul.f32 -1.442695, %v973_v40 }
 0xa54   :  { %1967 = vpow2.f32 %v1854_v43 }
 0xa58   :  { %v1966_v42 = vpop.eup %1965 }
 0xa59   :  { %999 = vrot.lane.b32.xlu2 %v1966_v42, %s2260_s4 }
 0xa5a   :  { %v1968_v48 = vpop.eup %1967 }
 0xa5b   :  { %v977_v9 = vadd.f32 1.0, %v1968_v48 }
 0xa5d   :  { %v989_v11 = vand.u32 2147483648, %v977_v9  ;;  %vm983_vm6 = vweird.f32 %v977_v9  ;;  %v987_v14 = vand.u32 2147483647, %v977_v9 }
 0xa5f   :  { %v990_v60 = vor.u32 1.1754944e-38, %v989_v11  ;;  %vm988_vm1 = vcmp.eq.f32.partialorder %v987_v14, 8.507059e+37 }
 0xa90   :  { %v936_v44 = vpop.permute.xlu1 %935 }
 0xa91   :  { %v2701_v3 = vadd.f32 %v936_v44, %v928_v18 }
 0xa93   :  { %1969 = vtanh.f32 %v2701_v3 }
 0xa94   :  { %1971 = vrcp.f32 %v977_v9 }
 0xa98   :  { %v1015_v15 = vpop.permute.xlu1 %1014 }
 0xa99   :  { %v1970_v13 = vpop.eup %1969 }
 0xa9a   :  { %941 = vrot.lane.b32.xlu0 %v1970_v13, %s2260_s4  ;;  %v1972_v16 = vpop.eup %1971 }
 0xa9b   :  { %v979_v53 = vmul.f32 %v1972_v16, %v977_v9  ;;  %vm984_vm5 = vweird.f32 %v1972_v16 }
 0xa9c   :  { %vm985_vm13 = vmor %vm983_vm6, %vm984_vm5 }
 0xa9d   :  { %v980_v4 = vsub.f32 1.0, %v979_v53 }
 0xa9f   :  { %v981_v54 = vmul.f32 %v1972_v16, %v980_v4 }
 0xaa1   :  { %v982_v6 = vadd.f32 %v1972_v16, %v981_v54 }
 0xaa3   :  { %v986_v59 = vsel %vm985_vm13, %v1972_v16, %v982_v6 }
 0xaa4   :  { %v991_v61 = vsel %vm988_vm1, %v990_v60, %v986_v59 }
 0xaa5   :  { %v997_v17 = vmul.f32 %v995_v8, %v991_v61 }
 0xab3   :  { %v1000_v1 = vpop.permute.xlu2 %999 }
 0xab4   :  { %v1002_v63 = vmul.f32 %v1000_v1, %v991_v61 }
 0xab6   :  { %1004 = vrot.lane.b32.xlu2 %v1002_v63, %s2261_s7 }
 0xb0c   :  { %v942_v5 = vpop.permute.xlu0 %941 }
 0xb0d   :  { %v2710_v7 = vmul.f32 %v942_v5, %v921_v32 }
 0xb0f   :  { %v1017_v19 = vsel %vm872_vm15, %v2710_v7, %v1015_v15 }
 0xb10   :  { %v1005_v49 = vpop.permute.xlu2 %1004  ;;  %1038 = vrot.lane.b32.xlu0 %v1017_v19, %s2261_s7 }
 0xb11   :  { %v1007_v20 = vadd.f32 %v1005_v49, %v997_v17  ;;  %v1018_v49 = vsel %vm872_vm15, %v2701_v3, %v2698_v45 }
 0xb13   :  { %1973 = vtanh.f32 %v1007_v20  ;;  %v1027_v26 = vrot.slane %v1007_v20, 6  ;;  %v1087_v20 = vrot.slane %v1018_v49, 6 }
 0xb19   :  { %v1974_v22 = vpop.eup %1973 }
 0xb1a   :  { %1010 = vrot.lane.b32.xlu1 %v1974_v22, %s2260_s4 }
 0xb82   :  { %v2717_v23 = vpop.permute.xlu0 %1038 }
 0xb83   :  { %1855 = vmatmul.msk.f32.vlgmr.msra.gmra.mxu2 %vm127_vm0, %v2717_v23 }
 0xb8c   :  { %v1011_v36 = vpop.permute.xlu1 %1010 }
 0xb8d   :  { %v1013_v57 = vmul.f32 %v1011_v36, %v991_v61 }
 0xb8f   :  { %v1020_v24 = vrot.slane %v1013_v57, 6 }
 0xb91   :  { %1021 = vrot.lane.b32.xlu2 %v1020_v24, %s2261_s7 }
 0xb99   :  { %1028 = vrot.lane.b32.xlu2 %v1027_v26, %s2262_s18 }
 0xbeb   :  { %v2723_v35 = vpop.permute.xlu2 %1021 }
 0xbec   :  { %v2729_v27 = vsel %vm855_vm14, %v2723_v35, %v2690_v10 }
 0xbed   :  { %1857 = vmatmul.msk.f32.vlgmr.msrb.gmra.mxu3 %vm127_vm0, %v2729_v27 }
 0xbf3   :  { %v1029_v59 = vpop.permute.xlu2 %1028 }
 0xc06   :  { %v1059_v31 = vpop.f32.mrf.mxu2 }
 0xc07   :  { %v1063_v32 = vrot.slane %v1059_v31, 6 }
 0xc09   :  { %v1065_v33 = vadd.f32 %v1063_v32, %v2439_v25 }
 0xc0b   :  { %1975 = vtanh.f32 %v1065_v33  ;;  %v1856_v34 = vmul.f32 -1.442695, %v1065_v33 }
 0xc0d   :  { %1977 = vpow2.f32 %v1856_v34 }
 0xc11   :  { %v1976_v47 = vpop.eup %1975 }
 0xc12   :  { %1091 = vrot.lane.b32.xlu0 %v1976_v47, %s2260_s4 }
 0xc13   :  { %v1978_v38 = vpop.eup %1977 }
 0xc14   :  { %v1069_v40 = vadd.f32 1.0, %v1978_v38 }
 0xc16   :  { %1979 = vrcp.f32 %v1069_v40  ;;  %v1081_v9 = vand.u32 2147483648, %v1069_v40  ;;  %vm1075_vm3 = vweird.f32 %v1069_v40  ;;  %v1079_v13 = vand.u32 2147483647, %v1069_v40 }
 0xc18   :  { %v1082_v4 = vor.u32 1.1754944e-38, %v1081_v9  ;;  %vm1080_vm5 = vcmp.eq.f32.partialorder %v1079_v13, 8.507059e+37 }
 0xc1a   :  { %1031 = vrot.lane.b32.xlu0 %v877_v51, %s2262_s18 }
 0xc1c   :  { %v1980_v10 = vpop.eup %1979 }
 0xc1d   :  { %v1071_v42 = vmul.f32 %v1980_v10, %v1069_v40  ;;  %vm1076_vm2 = vweird.f32 %v1980_v10 }
 0xc1e   :  { %vm1077_vm4 = vmor %vm1075_vm3, %vm1076_vm2 }
 0xc1f   :  { %v1072_v43 = vsub.f32 1.0, %v1071_v42 }
 0xc21   :  { %v1073_v18 = vmul.f32 %v1980_v10, %v1072_v43 }
 0xc23   :  { %v1074_v44 = vadd.f32 %v1980_v10, %v1073_v18 }
 0xc25   :  { %v1078_v53 = vsel %vm1077_vm4, %v1980_v10, %v1074_v44 }
 0xc26   :  { %v1083_v11 = vsel %vm1080_vm5, %v1082_v4, %v1078_v53 }
 0xc27   :  { %v1089_v36 = vmul.f32 %v1087_v20, %v1083_v11 }
 0xc70   :  { %v1126_v48 = vpop.f32.mrf.mxu3 }
 0xc71   :  { %v1130_v16 = vrot.slane %v1126_v48, 4 }
 0xc73   :  { %v1132_v54 = vadd.f32 %v1130_v16, %v2444_v28 }
 0xc75   :  { %1981 = vtanh.f32 %v1132_v54  ;;  %v1858_v51 = vmul.f32 -1.442695, %v1132_v54 }
 0xc77   :  { %1983 = vpow2.f32 %v1858_v51 }
 0xc7b   :  { %v1982_v61 = vpop.eup %1981 }
 0xc7d   :  { %v1984_v5 = vpop.eup %1983 }
 0xc7e   :  { %v1136_v8 = vadd.f32 1.0, %v1984_v5 }
 0xc80   :  { %1985 = vrcp.f32 %v1136_v8  ;;  %v1148_v31 = vand.u32 2147483648, %v1136_v8  ;;  %vm1142_vm13 = vweird.f32 %v1136_v8  ;;  %v1146_v32 = vand.u32 2147483647, %v1136_v8 }
 0xc82   :  { %v1149_v47 = vor.u32 1.1754944e-38, %v1148_v31  ;;  %vm1147_vm2 = vcmp.eq.f32.partialorder %v1146_v32, 8.507059e+37 }
 0xc84   :  { %v1092_v6 = vpop.permute.xlu0 %1091 }
 0xc85   :  { %v1094_v14 = vmul.f32 %v1092_v6, %v1083_v11 }
 0xc86   :  { %v1986_v15 = vpop.eup %1985 }
 0xc87   :  { %1096 = vrot.lane.b32.xlu1 %v1094_v14, %s2261_s7  ;;  %v1138_v17 = vmul.f32 %v1986_v15, %v1136_v8  ;;  %vm1143_vm6 = vweird.f32 %v1986_v15 }
 0xc88   :  { %vm1144_vm1 = vmor %vm1142_vm13, %vm1143_vm6 }
 0xc89   :  { %v1139_v19 = vsub.f32 1.0, %v1138_v17 }
 0xc8b   :  { %v1140_v22 = vmul.f32 %v1986_v15, %v1139_v19 }
 0xc8c   :  { %v1032_v60 = vpop.permute.xlu0 %1031 }
 0xc8d   :  { %v2740_v1 = vsel %vm855_vm14, %v1029_v59, %v1032_v60  ;;  %v1141_v26 = vadd.f32 %v1986_v15, %v1140_v22 }
 0xc8e   :  { %v1154_v63 = vrot.slane %v2740_v1, 4 }
 0xc8f   :  { %1160 = vrot.lane.b32.xlu1 %v1982_v61, %s2260_s4  ;;  %v1145_v33 = vsel %vm1144_vm1, %v1986_v15, %v1141_v26 }
 0xc90   :  { %1155 = vrot.lane.b32.xlu0 %v1154_v63, %s2261_s7  ;;  %v1150_v34 = vsel %vm1147_vm2, %v1149_v47, %v1145_v33 }
 0xcf9   :  { %v1097_v57 = vpop.permute.xlu1 %1096 }
 0xcfa   :  { %v1099_v24 = vadd.f32 %v1097_v57, %v1089_v36 }
 0xcfc   :  { %1987 = vtanh.f32 %v1099_v24  ;;  %v1183_v43 = vrot.slane %v1099_v24, 2 }
 0xd01   :  { %v1161_v38 = vpop.permute.xlu1 %1160 }
 0xd02   :  { %v1988_v40 = vpop.eup %1987  ;;  %v1163_v10 = vmul.f32 %v1161_v38, %v1150_v34  ;;  %v1156_v18 = vpop.permute.xlu0 %1155 }
 0xd03   :  { %1102 = vrot.lane.b32.xlu2 %v1988_v40, %s2260_s4  ;;  %v1158_v48 = vmul.f32 %v1156_v18, %v1150_v34 }
 0xd04   :  { %1165 = vrot.lane.b32.xlu1 %v1163_v10, %s2261_s7 }
 0xd5d   :  { %v1103_v45 = vpop.permute.xlu2 %1102 }
 0xd5e   :  { %v1105_v3 = vmul.f32 %v1103_v45, %v1083_v11 }
 0xd60   :  { %v1176_v42 = vrot.slane %v1105_v3, 2 }
 0xd62   :  { %1177 = vrot.lane.b32.xlu2 %v1176_v42, %s2261_s7 }
 0xd6a   :  { %1184 = vrot.lane.b32.xlu2 %v1183_v43, %s2262_s18 }
 0xd76   :  { %v1166_v44 = vpop.permute.xlu1 %1165 }
 0xd77   :  { %v1168_v9 = vadd.f32 %v1166_v44, %v1158_v48 }
 0xd79   :  { %1989 = vtanh.f32 %v1168_v9  ;;  %v1198_v5 = vrot.slane %v1168_v9, 4 }
 0xd7f   :  { %v1990_v13 = vpop.eup %1989 }
 0xd80   :  { %1171 = vrot.lane.b32.xlu0 %v1990_v13, %s2260_s4 }
 0xd88   :  { %1187 = vrot.lane.b32.xlu0 %v1018_v49, %s2262_s18 }
 0xdbc   :  { %v2755_v16 = vpop.permute.xlu2 %1177 }
 0xdbd   :  { %v2761_v53 = vsel %vm696_vm10, %v2755_v16, %v2717_v23 }
 0xdbe   :  { %1859 = vmatmul.msk.f32.vlgmr.msra.gmra.mxu0 %vm127_vm0, %v2761_v53 }
 0xdc4   :  { %v1185_v11 = vpop.permute.xlu2 %1184 }
 0xdf2   :  { %v1172_v4 = vpop.permute.xlu0 %1171 }
 0xdf3   :  { %v1174_v54 = vmul.f32 %v1172_v4, %v1150_v34 }
 0xdf5   :  { %v1192_v6 = vrot.slane %v1174_v54, 4 }
 0xdf7   :  { %1193 = vrot.lane.b32.xlu1 %v1192_v6, %s2261_s7 }
 0xdfa   :  { %v1188_v14 = vpop.permute.xlu0 %1187 }
 0xdfb   :  { %v2768_v59 = vsel %vm696_vm10, %v1185_v11, %v1188_v14 }
 0xdfc   :  { %v1253_v60 = vrot.slane %v2768_v59, 4 }
 0xdfe   :  { %1254 = vrot.lane.b32.xlu2 %v1253_v60, %s2261_s7 }
 0xe3b   :  { %v1225_v23 = vpop.f32.mrf.mxu0 }
 0xe3c   :  { %v1229_v61 = vrot.slane %v1225_v23, 4 }
 0xe3e   :  { %v1231_v63 = vadd.f32 %v1229_v61, %v2439_v25 }
 0xe40   :  { %1991 = vtanh.f32 %v1231_v63  ;;  %v1860_v17 = vmul.f32 -1.442695, %v1231_v63 }
 0xe42   :  { %1993 = vpow2.f32 %v1860_v17 }
 0xe46   :  { %v1992_v51 = vpop.eup %1991 }
 0xe47   :  { %1259 = vrot.lane.b32.xlu1 %v1992_v51, %s2260_s4 }
 0xe48   :  { %v1994_v19 = vpop.eup %1993 }
 0xe49   :  { %v1235_v49 = vadd.f32 1.0, %v1994_v19 }
 0xe4b   :  { %1995 = vrcp.f32 %v1235_v49  ;;  %v1247_v26 = vand.u32 2147483648, %v1235_v49  ;;  %vm1241_vm4 = vweird.f32 %v1235_v49  ;;  %v1245_v31 = vand.u32 2147483647, %v1235_v49 }
 0xe4d   :  { %v1248_v32 = vor.u32 1.1754944e-38, %v1247_v26  ;;  %vm1246_vm6 = vcmp.eq.f32.partialorder %v1245_v31, 8.507059e+37 }
 0xe4f   :  { %1199 = vrot.lane.b32.xlu1 %v1198_v5, %s2262_s18 }
 0xe51   :  { %v1996_v20 = vpop.eup %1995 }
 0xe52   :  { %v1237_v22 = vmul.f32 %v1996_v20, %v1235_v49  ;;  %vm1242_vm3 = vweird.f32 %v1996_v20 }
 0xe53   :  { %vm1243_vm5 = vmor %vm1241_vm4, %vm1242_vm3 }
 0xe54   :  { %v1238_v36 = vsub.f32 1.0, %v1237_v22 }
 0xe56   :  { %v1239_v57 = vmul.f32 %v1996_v20, %v1238_v36 }
 0xe58   :  { %v1240_v24 = vadd.f32 %v1996_v20, %v1239_v57  ;;  %v1255_v44 = vpop.permute.xlu2 %1254 }
 0xe69   :  { %v2775_v8 = vpop.permute.xlu1 %1193 }
 0xe6a   :  { %v2781_v15 = vsel %vm679_vm7, %v2775_v8, %v2729_v27  ;;  %v1244_v27 = vsel %vm1243_vm5, %v1996_v20, %v1240_v24 }
 0xe6b   :  { %1861 = vmatmul.msk.f32.vlgmr.msra.gmra.mxu1 %vm127_vm0, %v2781_v15  ;;  %v1249_v33 = vsel %vm1246_vm6, %v1248_v32, %v1244_v27 }
 0xe6c   :  { %v1257_v9 = vmul.f32 %v1255_v44, %v1249_v33 }
 0xeb9   :  { %v1260_v47 = vpop.permute.xlu1 %1259 }
 0xeba   :  { %v1262_v34 = vmul.f32 %v1260_v47, %v1249_v33 }
 0xebc   :  { %1264 = vrot.lane.b32.xlu0 %v1262_v34, %s2261_s7 }
 0xec1   :  { %v1200_v38 = vpop.permute.xlu1 %1199 }
 0xec2   :  { %v2789_v40 = vsel %vm679_vm7, %v1200_v38, %v2740_v1 }
 0xec3   :  { %v1322_v10 = vrot.slane %v2789_v40, 6 }
 0xec5   :  { %1323 = vrot.lane.b32.xlu1 %v1322_v10, %s2261_s7 }
 0xee8   :  { %v1294_v45 = vpop.f32.mrf.mxu1 }
 0xee9   :  { %v1298_v3 = vrot.slane %v1294_v45, 6 }
 0xeeb   :  { %v1300_v42 = vadd.f32 %v1298_v3, %v2444_v28 }
 0xeed   :  { %1997 = vtanh.f32 %v1300_v42  ;;  %v1862_v18 = vmul.f32 -1.442695, %v1300_v42 }
 0xeef   :  { %1999 = vpow2.f32 %v1862_v18 }
 0xef3   :  { %v1998_v43 = vpop.eup %1997 }
 0xef4   :  { %1328 = vrot.lane.b32.xlu2 %v1998_v43, %s2260_s4 }
 0xef5   :  { %v2000_v48 = vpop.eup %1999 }
 0xef6   :  { %v1304_v13 = vadd.f32 1.0, %v2000_v48 }
 0xef8   :  { %v1316_v61 = vand.u32 2147483648, %v1304_v13  ;;  %vm1310_vm1 = vweird.f32 %v1304_v13  ;;  %v1314_v63 = vand.u32 2147483647, %v1304_v13 }
 0xefa   :  { %v1317_v5 = vor.u32 1.1754944e-38, %v1316_v61  ;;  %vm1315_vm3 = vcmp.eq.f32.partialorder %v1314_v63, 8.507059e+37 }
 0xf2e   :  { %v1265_v1 = vpop.permute.xlu0 %1264 }
 0xf2f   :  { %v1267_v4 = vadd.f32 %v1265_v1, %v1257_v9 }
 0xf31   :  { %2001 = vtanh.f32 %v1267_v4  ;;  %v1350_v32 = vrot.slane %v1267_v4, 4 }
 0xf32   :  { %2003 = vrcp.f32 %v1304_v13 }
 0xf37   :  { %v2002_v54 = vpop.eup %2001  ;;  %v1324_v20 = vpop.permute.xlu1 %1323 }
 0xf38   :  { %v2004_v6 = vpop.eup %2003  ;;  %1270 = vrot.lane.b32.xlu0 %v2002_v54, %s2260_s4 }
 0xf39   :  { %v1306_v11 = vmul.f32 %v2004_v6, %v1304_v13  ;;  %vm1311_vm13 = vweird.f32 %v2004_v6 }
 0xf3a   :  { %vm1312_vm2 = vmor %vm1310_vm1, %vm1311_vm13 }
 0xf3b   :  { %v1307_v14 = vsub.f32 1.0, %v1306_v11 }
 0xf3d   :  { %v1308_v60 = vmul.f32 %v2004_v6, %v1307_v14 }
 0xf3f   :  { %v1309_v23 = vadd.f32 %v2004_v6, %v1308_v60 }
 0xf41   :  { %v1313_v51 = vsel %vm1312_vm2, %v2004_v6, %v1309_v23 }
 0xf42   :  { %v1318_v17 = vsel %vm1315_vm3, %v1317_v5, %v1313_v51 }
 0xf43   :  { %v1326_v22 = vmul.f32 %v1324_v20, %v1318_v17 }
 0xf4e   :  { %v1329_v19 = vpop.permute.xlu2 %1328 }
 0xf4f   :  { %v1331_v49 = vmul.f32 %v1329_v19, %v1318_v17 }
 0xf51   :  { %1333 = vrot.lane.b32.xlu2 %v1331_v49, %s2261_s7 }
 0xfaa   :  { %v1271_v36 = vpop.permute.xlu0 %1270 }
 0xfab   :  { %v1273_v57 = vmul.f32 %v1271_v36, %v1249_v33  ;;  %v1334_v24 = vpop.permute.xlu2 %1333 }
 0xfac   :  { %v1336_v26 = vadd.f32 %v1334_v24, %v1326_v22  ;;  %v2844_v22 = vsel %vm679_vm7, %v2602_v50, 0.0 }
 0xfad   :  { %v1344_v31 = vrot.slane %v1273_v57, 4  ;;  %v1543_v36 = vrot.slane %v2844_v22, 6 }
 0xfae   :  { %2005 = vtanh.f32 %v1336_v26  ;;  %v1362_v9 = vrot.slane %v1336_v26, 2 }
 0xfaf   :  { %1345 = vrot.lane.b32.xlu0 %v1344_v31, %s2261_s7 }
 0xfb4   :  { %v2006_v27 = vpop.eup %2005 }
 0xfb5   :  { %1339 = vrot.lane.b32.xlu1 %v2006_v27, %s2260_s4 }
 0xfb7   :  { %1351 = vrot.lane.b32.xlu0 %v1350_v32, %s2262_s18 }
0x1021   :  { %v2800_v47 = vpop.permute.xlu0 %1345 }
0x1022   :  { %v2806_v34 = vsel %vm516_vm9, %v2800_v47, %v2761_v53 }
0x1023   :  { %1863 = vmatmul.msk.f32.vlgmr.msrb.gmra.mxu2 %vm127_vm0, %v2806_v34 }
0x1027   :  { %v1340_v33 = vpop.permute.xlu1 %1339 }
0x1028   :  { %v1342_v38 = vmul.f32 %v1340_v33, %v1318_v17 }
0x1029   :  { %v1352_v45 = vpop.permute.xlu0 %1351 }
0x102a   :  { %v1356_v10 = vrot.slane %v1342_v38, 2  ;;  %v2814_v3 = vsel %vm516_vm9, %v1352_v45, %v2768_v59 }
0x102b   :  { %v1417_v42 = vrot.slane %v2814_v3, 2 }
0x102c   :  { %1357 = vrot.lane.b32.xlu2 %v1356_v10, %s2261_s7 }
0x1034   :  { %1418 = vrot.lane.b32.xlu2 %v1417_v42, %s2261_s7 }
0x1086   :  { %v2818_v53 = vpop.permute.xlu2 %1357 }
0x1087   :  { %v2824_v43 = vsel %vm495_vm8, %v2818_v53, %v2781_v15 }
0x1088   :  { %1865 = vmatmul.msk.f32.vlgmr.msra.gmra.mxu3 %vm127_vm0, %v2824_v43 }
0x108e   :  { %v1419_v33 = vpop.permute.xlu2 %1418 }
0x10a6   :  { %v1389_v18 = vpop.f32.mrf.mxu2 }
0x10a7   :  { %v1393_v48 = vrot.slane %v1389_v18, 2 }
0x10a9   :  { %v1395_v59 = vadd.f32 %v1393_v48, %v2439_v25 }
0x10ab   :  { %2007 = vtanh.f32 %v1395_v59  ;;  %v1864_v13 = vmul.f32 -1.442695, %v1395_v59 }
0x10ad   :  { %2009 = vpow2.f32 %v1864_v13  ;;  %v1204_v13 = vsel %vm679_vm7, %v2775_v8, 0.0  ;;  %vm1572_vm7 = vcmask 1041408  }
0x10b1   :  { %v2008_v44 = vpop.eup %2007 }
0x10b2   :  { %1423 = vrot.lane.b32.xlu1 %v2008_v44, %s2260_s4  ;;  %v529_v44 = vsel %vm495_vm8, %v2537_v0, 0.0  ;;  %v530_v0 = vsel %vm516_vm9, %v2552_v2, 0.0  ;;  %v1368_v2 = vsel %vm495_vm8, %v2818_v53, 0.0  ;;  %v1036_v53 = vsel %vm855_vm14, %v2723_v35, 0.0 }
0x10b3   :  { %v2010_v1 = vpop.eup %2009 }
0x10b4   :  { %v1399_v4 = vadd.f32 1.0, %v2010_v1  ;;  %v1590_v1 = vrot.slane %v1204_v13, 6 }
0x10b6   :  { %2011 = vrcp.f32 %v1399_v4  ;;  %v1411_v61 = vand.u32 2147483648, %v1399_v4  ;;  %vm1405_vm5 = vweird.f32 %v1399_v4  ;;  %v1409_v63 = vand.u32 2147483647, %v1399_v4 }
0x10b8   :  { %v1412_v5 = vor.u32 1.1754944e-38, %v1411_v61  ;;  %vm1410_vm13 = vcmp.eq.f32.partialorder %v1409_v63, 8.507059e+37 }
0x10ba   :  { %1363 = vrot.lane.b32.xlu1 %v1362_v9, %s2262_s18  ;;  %v1538_v9 = vrot.slane %v529_v44, 7 }
0x10bc   :  { %v2012_v6 = vpop.eup %2011 }
0x10bd   :  { %v1401_v11 = vmul.f32 %v2012_v6, %v1399_v4  ;;  %vm1406_vm4 = vweird.f32 %v2012_v6  ;;  %v1203_v4 = vsel %vm696_vm10, %v2755_v16, 0.0  ;;  %v1672_v16 = vrot.slane %v1204_v13, 7 }
0x10be   :  { %vm1407_vm6 = vmor %vm1405_vm5, %vm1406_vm4  ;;  %vm1576_vm5 = vcmask 1043456  }
0x10bf   :  { %v1402_v25 = vsub.f32 1.0, %v1401_v11 }
0x10c1   :  { %v1403_v60 = vmul.f32 %v2012_v6, %v1402_v25  ;;  %v1585_v25 = vrot.slane %v1368_v2, 7 }
0x10c3   :  { %v1404_v23 = vadd.f32 %v2012_v6, %v1403_v60  ;;  %v1686_v60 = vrot.slane %v530_v0, 3 }
0x10c5   :  { %v1408_v51 = vsel %vm1407_vm6, %v2012_v6, %v1404_v23  ;;  %vm1580_vm6 = vcmask 1045504  }
0x10c6   :  { %v2833_v19 = vsel %vm1410_vm13, %v1412_v5, %v1408_v51  ;;  %vm1582_vm13 = vcmask 1046528  }
0x10c7   :  { %v1421_v46 = vmul.f32 %v1419_v33, %v2833_v19 }
0x110b   :  { %v1458_v15 = vpop.f32.mrf.mxu3 }
0x110c   :  { %v1461_v54 = vadd.f32 %v1458_v15, %v2444_v28  ;;  %v1556_v15 = vrot.slane %v1203_v4, 3 }
0x110e   :  { %2013 = vtanh.f32 %v1461_v54  ;;  %v1866_v57 = vmul.f32 -1.442695, %v1461_v54  ;;  %v1608_v54 = vrot.slane %v530_v0, 2 }
0x1110   :  { %2015 = vpow2.f32 %v1866_v57  ;;  %v1676_v57 = vrot.slane %v1036_v53, 6 }
0x1114   :  { %v2014_v14 = vpop.eup %2013 }
0x1115   :  { %1488 = vrot.lane.b32.xlu2 %v2014_v14, %s2260_s4  ;;  %v1647_v14 = vrot.slane %v1203_v4, 4 }
0x1116   :  { %v2016_v24 = vpop.eup %2015 }
0x1117   :  { %v1465_v26 = vadd.f32 1.0, %v2016_v24 }
0x1119   :  { %2017 = vrcp.f32 %v1465_v26  ;;  %v1477_v10 = vand.u32 2147483648, %v1465_v26  ;;  %vm1471_vm2 = vweird.f32 %v1465_v26  ;;  %v1475_v50 = vand.u32 2147483647, %v1465_v26 }
0x111b   :  { %v1478_v42 = vor.u32 1.1754944e-38, %v1477_v10  ;;  %vm1476_vm4 = vcmp.eq.f32.partialorder %v1475_v50, 8.507059e+37 }
0x111f   :  { %v2018_v31 = vpop.eup %2017 }
0x1120   :  { %v1467_v27 = vmul.f32 %v2018_v31, %v1465_v26  ;;  %vm1472_vm1 = vweird.f32 %v2018_v31 }
0x1121   :  { %vm1473_vm3 = vmor %vm1471_vm2, %vm1472_vm1 }
0x1122   :  { %v1468_v32 = vsub.f32 1.0, %v1467_v27  ;;  %v710_v27 = vsel %vm696_vm10, %v2620_v52, 0.0  ;;  %vm1574_vm10 = vcmask 1042432  }
0x1124   :  { %v1424_v17 = vpop.permute.xlu1 %1423 }
0x1125   :  { %v1426_v28 = vmul.f32 %v1424_v17, %v2833_v19  ;;  %v1595_v17 = vrot.slane %v1036_v53, 5 }
0x1127   :  { %1428 = vrot.lane.b32.xlu0 %v1426_v28, %s2261_s7  ;;  %v1367_v28 = vsel %vm516_vm9, %v2800_v47, 0.0  ;;  %vm1570_vm9 = vcmask 1040384  }
0x1128   :  { %v1651_v35 = vrot.slane %v1367_v28, 3 }
0x112c   :  { %v1364_v49 = vpop.permute.xlu1 %1363 }
0x112d   :  { %v1366_v20 = vsel %vm495_vm8, %v1364_v49, %v2789_v40  ;;  %v1469_v40 = vmul.f32 %v2018_v31, %v1468_v32  ;;  %v1561_v49 = vrot.slane %v1367_v28, 2  ;;  %v1682_v32 = vrot.slane %v710_v27, 4 }
0x112e   :  { %1483 = vrot.lane.b32.xlu1 %v1366_v20, %s2261_s7  ;;  %v1612_v20 = vrot.slane %v2489_v39, 1  ;;  %v1603_v39 = vrot.slane %v710_v27, 3  ;;  %vm1522_vm8 = vcmask 254976  }
0x112f   :  { %v1470_v38 = vadd.f32 %v2018_v31, %v1469_v40 }
0x1131   :  { %v1474_v45 = vsel %vm1473_vm3, %v2018_v31, %v1470_v38 }
0x1132   :  { %v2848_v18 = vsel %vm1476_vm4, %v1478_v42, %v1474_v45 }
0x1136   :  { %1544 = vrot.lane.b32.xlu1 %v1543_v36, %s2262_s18  ;;  %v1637_v36 = vrot.slane %v2844_v22, 7  ;;  %v878_v22 = vsel %vm855_vm14, %v2668_v58, 0.0  ;;  %vm1578_vm14 = vcmask 1044480  }
0x1137   :  { %v1548_v31 = vrot.slane %v878_v22, 5 }
0x116f   :  { %v1489_v48 = vpop.permute.xlu2 %1488 }
0x1170   :  { %v1491_v59 = vmul.f32 %v1489_v48, %v2848_v18 }
0x1172   :  { %1493 = vrot.lane.b32.xlu2 %v1491_v59, %s2261_s7 }
0x117a   :  { %1539 = vrot.lane.b32.xlu2 %v1538_v9, %s2262_s18  ;;  %v1035_v9 = vsel %vm872_vm15, %v2710_v7, 0.0 }
0x1182   :  { %1591 = vrot.lane.b32.xlu2 %v1590_v1, %s2262_s18 }
0x118a   :  { %1557 = vrot.lane.b32.xlu2 %v1556_v15, %s2262_s18 }
0x1192   :  { %1609 = vrot.lane.b32.xlu2 %v1608_v54, %s2262_s18 }
0x1199   :  { %v1429_v8 = vpop.permute.xlu0 %1428 }
0x119a   :  { %v2869_v6 = vadd.f32 %v1429_v8, %v1421_v46  ;;  %1634 = vrot.lane.b32.xlu2 %v529_v44, %s2262_s18  ;;  %v879_v8 = vsel %vm872_vm15, %v2677_v41, 0.0  ;;  %vm1710_vm15 = vcmask 523264  }
0x119c   :  { %2019 = vtanh.f32 %v2869_v6 }
0x11a0   :  { %v1484_v23 = vpop.permute.xlu1 %1483 }
0x11a1   :  { %v1486_v61 = vmul.f32 %v1484_v23, %v2848_v18 }
0x11a2   :  { %v2020_v11 = vpop.eup %2019  ;;  %1673 = vrot.lane.b32.xlu2 %v1672_v16, %s2262_s18 }
0x11a3   :  { %1434 = vrot.lane.b32.xlu0 %v2020_v11, %s2260_s4 }
0x11a8   :  { %v1545_v21 = vpop.permute.xlu1 %1544 }
0x11aa   :  { %1648 = vrot.lane.b32.xlu2 %v1647_v14, %s2262_s18 }
0x11ab   :  { %1586 = vrot.lane.b32.xlu0 %v1585_v25, %s2262_s18 }
0x11b2   :  { %1687 = vrot.lane.b32.xlu2 %v1686_v60, %s2262_s18  ;;  %v1600_v60 = vrot.slane %v879_v8, 4 }
0x11cc   :  { %v1494_v63 = vpop.permute.xlu2 %1493 }
0x11cd   :  { %v1496_v51 = vadd.f32 %v1494_v63, %v1486_v61 }
0x11cf   :  { %2021 = vtanh.f32 %v1496_v51  ;;  %v2884_v5 = vsel %vm327_vm11, %v1496_v51, %v1484_v23 }
0x11d4   :  { %v1540_v58 = vpop.permute.xlu2 %1539 }
0x11d5   :  { %v2022_v55 = vpop.eup %2021  ;;  %v1571_v13 = vsel %vm1570_vm9, %v2470_v30, %v1540_v58 }
0x11d6   :  { %1499 = vrot.lane.b32.xlu1 %v2022_v55, %s2260_s4  ;;  %v1573_v4 = vsel %vm1572_vm7, %v1571_v13, %v1545_v21  ;;  %v1714_v13 = vld [vmem:[#allocation10 + $0x8] sm:$0xff] }
0x11dc   :  { %v1592_v33 = vpop.permute.xlu2 %1591 }
0x11de   :  { %1596 = vrot.lane.b32.xlu1 %v1595_v17, %s2262_s18 }
0x11e4   :  { %v1558_v10 = vpop.permute.xlu2 %1557 }
0x11e6   :  { %1562 = vrot.lane.b32.xlu1 %v1561_v49, %s2262_s18 }
0x11ec   :  { %v1610_v45 = vpop.permute.xlu2 %1609 }
0x11ee   :  { %1613 = vrot.lane.b32.xlu1 %v1612_v20, %s2262_s18  ;;  %v1680_v20 = vrot.slane %v879_v8, 5 }
0x11f4   :  { %v1635_v16 = vpop.permute.xlu2 %1634 }
0x11f6   :  { %1638 = vrot.lane.b32.xlu1 %v1637_v36, %s2262_s18 }
0x11fc   :  { %v1674_v55 = vpop.permute.xlu2 %1673 }
0x11fe   :  { %1677 = vrot.lane.b32.xlu1 %v1676_v57, %s2262_s18 }
0x1206   :  { %1652 = vrot.lane.b32.xlu1 %v1651_v35, %s2262_s18 }
0x120e   :  { %1691 = vrot.lane.b32.xlu1 %v1690_v56, %s2262_s18  ;;  %v1632_v56 = vrot.slane %v2470_v30, 1 }
0x1215   :  { %v1435_v47 = vpop.permute.xlu0 %1434 }
0x1216   :  { %v1437_v24 = vmul.f32 %v1435_v47, %v2833_v19  ;;  %v1641_v19 = vrot.slane %v878_v22, 6  ;;  %v1659_v47 = vsel %vm1570_vm9, %v1632_v56, %v1635_v16 }
0x1218   :  { %v1504_v26 = vrot.slane %v1437_v24, 6  ;;  %v1649_v24 = vpop.permute.xlu2 %1648 }
0x121a   :  { %1505 = vrot.lane.b32.xlu0 %v1504_v26, %s2261_s7  ;;  %v1645_v26 = vrot.slane %v1035_v9, 5 }
0x121d   :  { %v1587_v50 = vpop.permute.xlu0 %1586 }
0x1220   :  { %v1688_v21 = vpop.permute.xlu2 %1687 }
0x1222   :  { %1549 = vrot.lane.b32.xlu0 %v1548_v31, %s2262_s18 }
0x122a   :  { %1604 = vrot.lane.b32.xlu0 %v1603_v39, %s2262_s18 }
0x1232   :  { %1669 = vrot.lane.b32.xlu0 %v1368_v2, %s2262_s18 }
0x123a   :  { %1642 = vrot.lane.b32.xlu0 %v1641_v19, %s2262_s18 }
0x1242   :  { %1683 = vrot.lane.b32.xlu0 %v1682_v32, %s2262_s18 }
0x1248   :  { %v1500_v40 = vpop.permute.xlu1 %1499 }
0x1249   :  { %v2922_v59 = vmul.f32 %v1500_v40, %v2848_v18  ;;  %v1553_v18 = vrot.slane %v1035_v9, 4  ;;  %v1715_v9 = vld [vmem:[#allocation10 + $0x10] sm:$0xff] }
0x124b   :  { %v1521_v1 = vsel %vm327_vm11, %v2922_v59, 0.0 }
0x124c   :  { %v1616_v0 = vsel %vm1570_vm9, %v1521_v1, %v1587_v50  ;;  %v1667_v53 = vrot.slane %v1521_v1, 1  ;;  %v1719_v50 = vld [vmem:[#allocation10 + $0x30] sm:$0xff] }
0x124d   :  { %v1617_v2 = vsel %vm1572_vm7, %v1616_v0, %v1592_v33  ;;  %v1713_v0 = vld [vmem:[#allocation10] sm:$0xff] }
0x1250   :  { %v1597_v38 = vpop.permute.xlu1 %1596 }
0x1251   :  { %v1618_v25 = vsel %vm1574_vm10, %v1617_v2, %v1597_v38 }
0x1252   :  { %v1619_v61 = vsel %vm1576_vm5, %v1618_v25, %v1600_v60 }
0x1258   :  { %v1563_v62 = vpop.permute.xlu1 %1562 }
0x128c   :  { %v1506_v52 = vpop.permute.xlu0 %1505 }
0x128d   :  { %v1508_v42 = vsel %vm334_vm12, %v1506_v52, %v2806_v34  ;;  %v1520_v48 = vsel %vm334_vm12, %v1506_v52, 0.0  ;;  %v1614_v34 = vpop.permute.xlu1 %1613  ;;  %v1717_v52 = vld [vmem:[#allocation10 + $0x20] sm:$0xff] }
0x128e   :  { %1523 = vst.msk [vmem:[#allocation14] sm:$0x3] %vm1522_vm8, %v1508_v42  ;;  %v1566_v44 = vrot.slane %v1520_v48, 1  ;;  %v1655_v54 = vrot.slane %v1520_v48, 2  ;;  %v1716_v42 = vld [vmem:[#allocation10 + $0x18] sm:$0xff] }
0x1290   :  { %1567 = vrot.lane.b32.xlu0 %v1566_v44, %s2262_s18 }
0x1294   :  { %v1550_v15 = vpop.permute.xlu0 %1549 }
0x1295   :  { %v1575_v7 = vsel %vm1574_vm10, %v1573_v4, %v1550_v15  ;;  %v1639_v23 = vpop.permute.xlu1 %1638 }
0x1296   :  { %v1577_v46 = vsel %vm1576_vm5, %v1575_v7, %v1553_v18  ;;  %v1660_v22 = vsel %vm1572_vm7, %v1659_v47, %v1639_v23 }
0x1297   :  { %v1579_v11 = vsel %vm1578_vm14, %v1577_v46, %v1558_v10  ;;  %v1720_v10 = vld [vmem:[#allocation10 + $0x38] sm:$0xff] }
0x1298   :  { %1656 = vrot.lane.b32.xlu0 %v1655_v54, %s2262_s18  ;;  %v1581_v14 = vsel %vm1580_vm6, %v1579_v11, %v1563_v62  ;;  %1735 = vmatpush.msrb.mxu0 %v1720_v10  ;;  %v1718_v62 = vld [vmem:[#allocation10 + $0x28] sm:$0xff] }
0x129a   :  { %1736 = vmatpush.msrb.mxu0 %v1719_v50 }
0x129c   :  { %v1605_v63 = vpop.permute.xlu0 %1604  ;;  %1737 = vmatpush.msrb.mxu0 %v1718_v62 }
0x129d   :  { %v1620_v29 = vsel %vm1578_vm14, %v1619_v61, %v1605_v63  ;;  %v1678_v28 = vpop.permute.xlu1 %1677 }
0x129e   :  { %v1621_v41 = vsel %vm1580_vm6, %v1620_v29, %v1610_v45  ;;  %1738 = vmatpush.msrb.mxu0 %v1717_v52 }
0x129f   :  { %v1622_v51 = vsel %vm1582_vm13, %v1621_v41, %v1614_v34  ;;  %v1510_v34 = vrot.slane %v2869_v6, 6 }
0x12a0   :  { %1628 = vrot.lane.b32.xlu0 %v1622_v51, %s2260_s4  ;;  %1739 = vmatpush.msrb.mxu0 %v1716_v42 }
0x12a2   :  { %1740 = vmatpush.msrb.mxu0 %v1715_v9 }
0x12a4   :  { %v1670_v17 = vpop.permute.xlu0 %1669  ;;  %1741 = vmatpush.msrb.mxu0 %v1714_v13 }
0x12a5   :  { %v1694_v49 = vsel %vm1570_vm9, %v1667_v53, %v1670_v17  ;;  %v1653_v19 = vpop.permute.xlu1 %1652 }
0x12a6   :  { %v1695_v36 = vsel %vm1572_vm7, %v1694_v49, %v1674_v55  ;;  %1742 = vmatpush.msrb.mxu0 %v1713_v0 }
0x12a7   :  { %v1696_v57 = vsel %vm1574_vm10, %v1695_v36, %v1678_v28 }
0x12a8   :  { %1515 = vrot.lane.b32.xlu0 %v2824_v43, %s2262_s18  ;;  %v1697_v35 = vsel %vm1576_vm5, %v1696_v57, %v1680_v20 }
0x12ac   :  { %v1643_v31 = vpop.permute.xlu0 %1642 }
0x12ad   :  { %v1661_v27 = vsel %vm1574_vm10, %v1660_v22, %v1643_v31 }
0x12ae   :  { %v1662_v39 = vsel %vm1576_vm5, %v1661_v27, %v1645_v26 }
0x12af   :  { %v1663_v32 = vsel %vm1578_vm14, %v1662_v39, %v1649_v24 }
0x12b0   :  { %1532 = vrot.lane.b32.xlu0 %v2884_v5, %s2262_s18  ;;  %v1664_v43 = vsel %vm1580_vm6, %v1663_v32, %v1653_v19  ;;  %v1692_v5 = vpop.permute.xlu1 %1691 }
0x12b4   :  { %v1684_v30 = vpop.permute.xlu0 %1683 }
0x12b5   :  { %v1698_v58 = vsel %vm1578_vm14, %v1697_v35, %v1684_v30 }
0x12b6   :  { %v1699_v40 = vsel %vm1580_vm6, %v1698_v58, %v1688_v21 }
0x12b7   :  { %v1700_v48 = vsel %vm1582_vm13, %v1699_v40, %v1692_v5 }
0x1302   :  { %v1568_v33 = vpop.permute.xlu0 %1567 }
0x1303   :  { %v1583_v38 = vsel %vm1582_vm13, %v1581_v14, %v1568_v33 }
0x1304   :  { %1624 = vrot.lane.b32.xlu2 %v1583_v38, %s2261_s7 }
0x130a   :  { %v1657_v45 = vpop.permute.xlu0 %1656 }
0x130b   :  { %v1665_v44 = vsel %vm1582_vm13, %v1664_v43, %v1657_v45 }
0x130c   :  { %1706 = vrot.lane.b32.xlu2 %v1700_v48, %s2260_s4  ;;  %1702 = vrot.lane.b32.xlu1 %v1665_v44, %s2261_s7 }
0x1312   :  { %v1629_v1 = vpop.permute.xlu0 %1628 }
0x1314   :  { %1511 = vrot.lane.b32.xlu1 %v1510_v34, %s2262_s18  ;;  %s1769_s18 = sshll.u32 %s2266_s17, 4  ;;  %s1770_s18 = int_to_ptr.vmem [resolvable:$true] %s1769_s18 }
0x131a   :  { %v1516_v18 = vpop.permute.xlu0 %1515 }
0x131b   :  { %v1518_v4 = vsel %vm327_vm11, %v2922_v59, %v1516_v18 }
0x131c   :  { %1525 = vrot.lane.b32.xlu2 %v1518_v4, %s2261_s7 }
0x1322   :  { %v1533_v15 = vpop.permute.xlu0 %1532 }
0x1323   :  { %1536 = vst.msk [vmem:[#allocation15 + $0x2] sm:$0x3] %vm1522_vm8, %v1533_v15 }
0x135e   :  { %v1625_v7 = vpop.permute.xlu2 %1624 }
0x135f   :  { %v1631_v54 = vsel %vm127_vm0, %v1625_v7, %v1629_v1 }
0x1360   :  { %1711 = vst.msk [vmem:[#allocation11] sm:$0xff] %vm1710_vm15, %v1631_v54  ;;  %1867 = vmatmul.msk.f32.vlgmr.msrb.gmra.mxu0 %vm1710_vm15, %v1631_v54 }
0x1366   :  { %v1707_v6 = vpop.permute.xlu2 %1706 }
0x1376   :  { %v1526_v46 = vpop.permute.xlu2 %1525 }
0x1377   :  { %1529 = vst.msk [vmem:[#allocation14 + $0x2] sm:$0x3] %vm1522_vm8, %v1526_v46 }
0x137e   :  { %v1703_v12 = vpop.permute.xlu1 %1702 }
0x137f   :  { %v1709_v59 = vsel %vm127_vm0, %v1703_v12, %v1707_v6 }
0x1380   :  { %1712 = vst.msk [vmem:[#allocation11 + $0x8] sm:$0xff] %vm1710_vm15, %v1709_v59  ;;  %1868 = vmatmul.msk.f32.gmra.mxu0 %vm1710_vm15, %v1709_v59 }
0x1381   :  { %1764 = dma.vmem_to_hbm [thread:$0]  %s1757_s14, 256, %s1759_s0, [#allocation4], %s2252_s29, %s2252_s29, %s2253_s30  }
0x1386   :  { %v1512_v8 = vpop.permute.xlu1 %1511 }
0x1387   :  { %v1514_v16 = vsel %vm334_vm12, %v1512_v8, %v2814_v3 }
0x1388   :  { %1530 = vst.msk [vmem:[#allocation15] sm:$0x3] %vm1522_vm8, %v1514_v16 }
0x1389   :  { %1803 = dma.vmem_to_hbm [thread:$0]  %s1796_s16, 64, %s1798_s6, [#allocation16], %s2261_s7, %s2261_s7, %s2265_s9  }
0x13dd   :  { %v1744_v11 = vpop.f32.mrf.mxu0 }
0x13de   :  { %1750 = vst.msk [vmem:[#allocation12] sm:$0xff] %vm1710_vm15, %v1744_v11 }
0x13fd   :  { %v1747_v37 = vpop.f32.mrf.mxu0 }
0x13fe   :  { %1751 = vst.msk [vmem:[#allocation12 + $0x8] sm:$0xff] %vm1710_vm15, %v1747_v37 }
0x13ff   :  { %1777 = dma.vmem_to_hbm [thread:$0]  %s1770_s18, 256, %s1772_s12, [#allocation13], %s2252_s29, %s2252_s29, %s2253_s30  }
0x1400   :  { %1790 = dma.vmem_to_hbm [thread:$0]  %s1783_s2, 64, %s1785_s24, [#allocation13], %s2261_s7, %s2261_s7, %s2265_s9  }
0x1401   :  { %2245 = dma.done.wait [#allocation4], 256  }
0x1402   :  { %2246 = vsyncadd [#allocation4], 4294967040 }
0x1403   :  { %2247 = dma.done.wait [#allocation13], 320  }
0x1404   :  { %2248 = vsyncadd [#allocation13], 4294966976 }
0x1405   :  { %2249 = dma.done.wait [#allocation16], 64  }
0x1406   :  { %2250 = vsyncadd [#allocation16], 4294967232 }
0x1407   :  { %1820 = vsyncpa [#allocation3], 1 }
0x1408   :  { %1821 = vsyncpa [#allocation6], 1 }
0x1409   :  { %1822 = vsyncpa [#allocation9], 1 }
0x140a   :  { %1823 = vsyncpa [#allocation4], 1 }
0x140b   :  { %1824 = vsyncpa [#allocation13], 1 }
0x140c   :  { %1825 = vsyncpa [#allocation16], 1 }

</bundles_post_ra>
